<compile_context>
chip_gen: v5e
topology: v5e:2x2
jax: 0.10.0
libtpu: 0.0.40
codegen_flags: <defaults>
</compile_context>

<pallas_src>
import jax
import jax.numpy as jnp
from jax import lax
from jax.experimental import pallas as pl
from jax.experimental.pallas import tpu as pltpu

INPUT_SIZE = 28
HIDDEN = 64          # real hidden size (PyTorch module)
HP = 128             # lane-padded hidden size (one full vreg lane group per gate)
OUT = 10             # real output size
OUTP = 128           # lane-padded output size
SUB = 8              # sublane width


def _make_kernel(T, Bp):
    """Single-invocation LSTM kernel. Shapes (all f32):
         x_ref    : (T*Bp, INPUT_SIZE)   time-major, batch-padded, flattened
         wih_ref  : (INPUT_SIZE, 4*HP)   gate-k columns at [k*HP, k*HP+HIDDEN)
         whh_ref  : (HP, 4*HP)           rows >= HIDDEN are zero
         b_ref    : (1, 4*HP)            b_ih + b_hh, lane-aligned per gate
         wout_ref : (HP, OUTP)           rows >= HIDDEN / cols >= OUT are zero
         bout_ref : (1, OUTP)
         out_ref  : (Bp, OUTP)
         gx_sc    : (T*Bp, 4*HP)         VMEM scratch for the hoisted input projection
    """

    def kernel(x_ref, wih_ref, whh_ref, b_ref, wout_ref, bout_ref, out_ref, gx_sc):
        # Hoisted input projection: one MXU pass covering every timestep.
        gx_sc[...] = (
            jnp.dot(x_ref[...], wih_ref[...], preferred_element_type=jnp.float32)
            + b_ref[...]
        )

        def step(t, carry):
            h, c = carry
            # Recurrent path: single (Bp, HP) x (HP, 4*HP) matmul + gate math.
            gates = (
                gx_sc[pl.ds(t * Bp, Bp), :]
                + jnp.dot(h, whh_ref[...], preferred_element_type=jnp.float32)
            )
            i_g = jax.nn.sigmoid(gates[:, 0 * HP:1 * HP])
            f_g = jax.nn.sigmoid(gates[:, 1 * HP:2 * HP])
            g_g = jnp.tanh(gates[:, 2 * HP:3 * HP])
            o_g = jax.nn.sigmoid(gates[:, 3 * HP:4 * HP])
            c_new = f_g * c + i_g * g_g
            h_new = o_g * jnp.tanh(c_new)
            # Padded lanes (>= HIDDEN): bias/weights are zero there, so
            # c_new = 0.5*0 + 0.5*tanh(0) = 0 and h_new = 0.5*tanh(0) = 0 — the
            # zero invariant is preserved every step.
            return h_new, c_new

        zeros = jnp.zeros((Bp, HP), jnp.float32)
        h_last, _ = lax.fori_loop(0, T, step, (zeros, zeros), unroll=True)

        out_ref[...] = (
            jnp.dot(h_last, wout_ref[...], preferred_element_type=jnp.float32)
            + bout_ref[...]
        )

    return kernel


def rnn_forward(x, params):
    """x: (B, T, INPUT_SIZE) batch_first (PyTorch convention). Returns (B, OUT)."""
    w_ih, w_hh, b_ih, b_hh, w_out, b_out = params
    B, T, I = x.shape
    H = HIDDEN
    Bp = max(SUB, ((B + SUB - 1) // SUB) * SUB)

    # Time-major, zero-pad batch to a full sublane group, flatten (T, Bp) -> rows.
    x_tm = jnp.transpose(x, (1, 0, 2)).astype(jnp.float32)          # (T, B, I)
    x_tm = jnp.pad(x_tm, ((0, 0), (0, Bp - B), (0, 0)))             # (T, Bp, I)
    x2d = x_tm.reshape(T * Bp, I)                                   # (T*Bp, I)

    # Lane-aligned gate layout: gate k occupies columns [k*HP, k*HP + H), rest zero.
    def lane_align_gates(m):                                        # (rows, 4H) -> (rows, 4HP)
        rows = m.shape[0]
        out = jnp.zeros((rows, 4 * HP), jnp.float32)
        for k in range(4):
            out = out.at[:, k * HP:k * HP + H].set(m[:, k * H:(k + 1) * H])
        return out

    wih_p = lane_align_gates(w_ih.T)                                # (I, 4*HP)
    whh_p = jnp.zeros((HP, 4 * HP), jnp.float32).at[:H].set(lane_align_gates(w_hh.T))
    b_p = lane_align_gates((b_ih + b_hh).reshape(1, 4 * H))         # (1, 4*HP)

    wout_p = jnp.zeros((HP, OUTP), jnp.float32).at[:H, :OUT].set(w_out.T)
    bout_p = jnp.zeros((1, OUTP), jnp.float32).at[0, :OUT].set(b_out)

    # Single kernel invocation (no grid): every operand is a full-array VMEM block.
    # Total VMEM footprint is < 1 MiB, far below any generation's limit.
    out_padded = pl.pallas_call(
        _make_kernel(T, Bp),
        out_shape=jax.ShapeDtypeStruct((Bp, OUTP), jnp.float32),
        scratch_shapes=[pltpu.VMEM((T * Bp, 4 * HP), jnp.float32)],
    )(x2d, wih_p, whh_p, b_p, wout_p, bout_p)

    # TODO(synk): for large batches on v7x, add a batch grid axis marked "parallel"
    # so the second TensorCore is used; unnecessary at B=2.
    return out_padded[:B, :OUT]


def rnn_reference(x, params):
    """Pure-JAX reference matching torch.nn.LSTM + Linear on the last step."""
    w_ih, w_hh, b_ih, b_hh, w_out, b_out = params
    B, T, I = x.shape
    H = HIDDEN

    def step(carry, x_t):
        h, c = carry
        gates = x_t @ w_ih.T + b_ih + h @ w_hh.T + b_hh
        i_g = jax.nn.sigmoid(gates[:, 0 * H:1 * H])
        f_g = jax.nn.sigmoid(gates[:, 1 * H:2 * H])
        g_g = jnp.tanh(gates[:, 2 * H:3 * H])
        o_g = jax.nn.sigmoid(gates[:, 3 * H:4 * H])
        c_new = f_g * c + i_g * g_g
        h_new = o_g * jnp.tanh(c_new)
        return (h_new, c_new), None

    h0 = jnp.zeros((B, H), jnp.float32)
    c0 = jnp.zeros((B, H), jnp.float32)
    (h_last, _), _ = lax.scan(step, (h0, c0), jnp.transpose(x, (1, 0, 2)))
    return h_last @ w_out.T + b_out


def init_params(key):
    """Deterministic init mimicking PyTorch's U(-1/sqrt(H), 1/sqrt(H))."""
    ks = jax.random.split(key, 6)
    bound = 1.0 / jnp.sqrt(jnp.float32(HIDDEN))
    u = lambda k, shape: jax.random.uniform(k, shape, jnp.float32, -bound, bound)
    w_ih = u(ks[0], (4 * HIDDEN, INPUT_SIZE))
    w_hh = u(ks[1], (4 * HIDDEN, HIDDEN))
    b_ih = u(ks[2], (4 * HIDDEN,))
    b_hh = u(ks[3], (4 * HIDDEN,))
    w_out = u(ks[4], (OUT, HIDDEN))
    b_out = u(ks[5], (OUT,))
    return (w_ih, w_hh, b_ih, b_hh, w_out, b_out)


if __name__ == "__main__":
    key = jax.random.PRNGKey(0)
    pkey, xkey = jax.random.split(key)
    params = init_params(pkey)

    B, T = 2, 8
    x = jax.random.normal(xkey, (B, T, INPUT_SIZE), jnp.float32)

    out = jax.block_until_ready(rnn_forward(x, params))
    ref = jax.block_until_ready(rnn_reference(x, params))

    assert out.shape == (B, OUT), out.shape
    assert jnp.allclose(out, ref, atol=1e-4, rtol=1e-4), (
        f"max abs err {jnp.max(jnp.abs(out - ref))}")
    print("KERNEL_OK")
</pallas_src>

<mosaic_0001>
module attributes {stable_mosaic.version = 11 : i64} {
  func.func @kernel(%arg0: memref<64x28xf32, #tpu.memory_space<vmem>>, %arg1: memref<28x512xf32, #tpu.memory_space<vmem>>, %arg2: memref<128x512xf32, #tpu.memory_space<vmem>>, %arg3: memref<1x512xf32, #tpu.memory_space<vmem>>, %arg4: memref<128x128xf32, #tpu.memory_space<vmem>>, %arg5: memref<1x128xf32, #tpu.memory_space<vmem>>, %arg6: memref<8x128xf32, #tpu.memory_space<vmem>>, %arg7: memref<64x512xf32, #tpu.memory_space<vmem>>) attributes {dimension_semantics = [], scalar_prefetch = 0 : i64, scratch_operands = 1 : i64, tpu.core_type = #tpu.core_type<tc>} {
    %c0 = arith.constant 0 : index
    %c0_0 = arith.constant 0 : index
    %0 = vector.load %arg0[%c0, %c0_0] : memref<64x28xf32, #tpu.memory_space<vmem>>, vector<64x28xf32>
    %c0_1 = arith.constant 0 : index
    %c0_2 = arith.constant 0 : index
    %1 = vector.load %arg1[%c0_1, %c0_2] : memref<28x512xf32, #tpu.memory_space<vmem>>, vector<28x512xf32>
    %cst = arith.constant dense<0.000000e+00> : vector<64x512xf32>
    %2 = tpu.matmul %0, %1, %cst {dimension_numbers = #tpu.dot_dimension_numbers<[1], [0], [0], [1], [0, 0, 1, 1], [], []>} : vector<64x28xf32>, vector<28x512xf32>, vector<64x512xf32> -> vector<64x512xf32>
    %c0_3 = arith.constant 0 : index
    %c0_4 = arith.constant 0 : index
    %3 = vector.load %arg3[%c0_3, %c0_4] : memref<1x512xf32, #tpu.memory_space<vmem>>, vector<1x512xf32>
    %4 = vector.broadcast %3 : vector<1x512xf32> to vector<64x512xf32>
    %5 = arith.addf %2, %4 : vector<64x512xf32>
    %c0_5 = arith.constant 0 : index
    %c0_6 = arith.constant 0 : index
    %6 = vector.load %arg7[%c0_5, %c0_6] : memref<64x512xf32, #tpu.memory_space<vmem>>, vector<64x512xf32>
    tpu.vector_store %arg7[%c0_5, %c0_6], %5 {strides = array<i32>} : memref<64x512xf32, #tpu.memory_space<vmem>>, vector<64x512xf32>,
    %cst_7 = arith.constant 0.000000e+00 : f32
    %7 = vector.broadcast %cst_7 : f32 to vector<8x128xf32>
    %c0_i32 = arith.constant 0 : i32
    %c8_i32 = arith.constant 8 : i32
    %8 = arith.muli %c0_i32, %c8_i32 : i32
    %9 = arith.index_cast %8 : i32 to index
    %c0_8 = arith.constant 0 : index
    %10 = vector.load %arg7[%9, %c0_8] : memref<64x512xf32, #tpu.memory_space<vmem>>, vector<8x512xf32>
    %c0_9 = arith.constant 0 : index
    %c0_10 = arith.constant 0 : index
    %11 = vector.load %arg2[%c0_9, %c0_10] : memref<128x512xf32, #tpu.memory_space<vmem>>, vector<128x512xf32>
    %cst_11 = arith.constant dense<0.000000e+00> : vector<8x512xf32>
    %12 = tpu.matmul %7, %11, %cst_11 {dimension_numbers = #tpu.dot_dimension_numbers<[1], [0], [0], [1], [0, 0, 1, 1], [], []>} : vector<8x128xf32>, vector<128x512xf32>, vector<8x512xf32> -> vector<8x512xf32>
    %13 = arith.addf %10, %12 : vector<8x512xf32>
    %14 = vector.extract_strided_slice %13 {offsets = [0, 0], sizes = [8, 128], strides = [1, 1]} : vector<8x512xf32> to vector<8x128xf32>
    %15 = arith.negf %14 : vector<8x128xf32>
    %16 = math.exp %15 : vector<8x128xf32>
    %cst_12 = arith.constant 1.000000e+00 : f32
    %17 = vector.broadcast %cst_12 : f32 to vector<8x128xf32>
    %18 = arith.addf %17, %16 : vector<8x128xf32>
    %19 = arith.divf %17, %18 : vector<8x128xf32>
    %20 = vector.extract_strided_slice %13 {offsets = [0, 128], sizes = [8, 128], strides = [1, 1]} : vector<8x512xf32> to vector<8x128xf32>
    %21 = arith.negf %20 : vector<8x128xf32>
    %22 = math.exp %21 : vector<8x128xf32>
    %cst_13 = arith.constant 1.000000e+00 : f32
    %23 = vector.broadcast %cst_13 : f32 to vector<8x128xf32>
    %24 = arith.addf %23, %22 : vector<8x128xf32>
    %25 = arith.divf %23, %24 : vector<8x128xf32>
    %26 = vector.extract_strided_slice %13 {offsets = [0, 256], sizes = [8, 128], strides = [1, 1]} : vector<8x512xf32> to vector<8x128xf32>
    %27 = math.tanh %26 : vector<8x128xf32>
    %28 = vector.extract_strided_slice %13 {offsets = [0, 384], sizes = [8, 128], strides = [1, 1]} : vector<8x512xf32> to vector<8x128xf32>
    %29 = arith.negf %28 : vector<8x128xf32>
    %30 = math.exp %29 : vector<8x128xf32>
    %cst_14 = arith.constant 1.000000e+00 : f32
    %31 = vector.broadcast %cst_14 : f32 to vector<8x128xf32>
    %32 = arith.addf %31, %30 : vector<8x128xf32>
    %33 = arith.divf %31, %32 : vector<8x128xf32>
    %34 = arith.mulf %25, %7 : vector<8x128xf32>
    %35 = arith.mulf %19, %27 : vector<8x128xf32>
    %36 = arith.addf %34, %35 : vector<8x128xf32>
    %37 = math.tanh %36 : vector<8x128xf32>
    %38 = arith.mulf %33, %37 : vector<8x128xf32>
    %c1_i32 = arith.constant 1 : i32
    %c8_i32_15 = arith.constant 8 : i32
    %39 = arith.muli %c1_i32, %c8_i32_15 : i32
    %40 = arith.index_cast %39 : i32 to index
    %c0_16 = arith.constant 0 : index
    %41 = vector.load %arg7[%40, %c0_16] : memref<64x512xf32, #tpu.memory_space<vmem>>, vector<8x512xf32>
    %c0_17 = arith.constant 0 : index
    %c0_18 = arith.constant 0 : index
    %42 = vector.load %arg2[%c0_17, %c0_18] : memref<128x512xf32, #tpu.memory_space<vmem>>, vector<128x512xf32>
    %cst_19 = arith.constant dense<0.000000e+00> : vector<8x512xf32>
    %43 = tpu.matmul %38, %42, %cst_19 {dimension_numbers = #tpu.dot_dimension_numbers<[1], [0], [0], [1], [0, 0, 1, 1], [], []>} : vector<8x128xf32>, vector<128x512xf32>, vector<8x512xf32> -> vector<8x512xf32>
    %44 = arith.addf %41, %43 : vector<8x512xf32>
    %45 = vector.extract_strided_slice %44 {offsets = [0, 0], sizes = [8, 128], strides = [1, 1]} : vector<8x512xf32> to vector<8x128xf32>
    %46 = arith.negf %45 : vector<8x128xf32>
    %47 = math.exp %46 : vector<8x128xf32>
    %cst_20 = arith.constant 1.000000e+00 : f32
    %48 = vector.broadcast %cst_20 : f32 to vector<8x128xf32>
    %49 = arith.addf %48, %47 : vector<8x128xf32>
    %50 = arith.divf %48, %49 : vector<8x128xf32>
    %51 = vector.extract_strided_slice %44 {offsets = [0, 128], sizes = [8, 128], strides = [1, 1]} : vector<8x512xf32> to vector<8x128xf32>
    %52 = arith.negf %51 : vector<8x128xf32>
    %53 = math.exp %52 : vector<8x128xf32>
    %cst_21 = arith.constant 1.000000e+00 : f32
    %54 = vector.broadcast %cst_21 : f32 to vector<8x128xf32>
    %55 = arith.addf %54, %53 : vector<8x128xf32>
    %56 = arith.divf %54, %55 : vector<8x128xf32>
    %57 = vector.extract_strided_slice %44 {offsets = [0, 256], sizes = [8, 128], strides = [1, 1]} : vector<8x512xf32> to vector<8x128xf32>
    %58 = math.tanh %57 : vector<8x128xf32>
    %59 = vector.extract_strided_slice %44 {offsets = [0, 384], sizes = [8, 128], strides = [1, 1]} : vector<8x512xf32> to vector<8x128xf32>
    %60 = arith.negf %59 : vector<8x128xf32>
    %61 = math.exp %60 : vector<8x128xf32>
    %cst_22 = arith.constant 1.000000e+00 : f32
    %62 = vector.broadcast %cst_22 : f32 to vector<8x128xf32>
    %63 = arith.addf %62, %61 : vector<8x128xf32>
    %64 = arith.divf %62, %63 : vector<8x128xf32>
    %65 = arith.mulf %56, %36 : vector<8x128xf32>
    %66 = arith.mulf %50, %58 : vector<8x128xf32>
    %67 = arith.addf %65, %66 : vector<8x128xf32>
    %68 = math.tanh %67 : vector<8x128xf32>
    %69 = arith.mulf %64, %68 : vector<8x128xf32>
    %c2_i32 = arith.constant 2 : i32
    %c8_i32_23 = arith.constant 8 : i32
    %70 = arith.muli %c2_i32, %c8_i32_23 : i32
    %71 = arith.index_cast %70 : i32 to index
    %c0_24 = arith.constant 0 : index
    %72 = vector.load %arg7[%71, %c0_24] : memref<64x512xf32, #tpu.memory_space<vmem>>, vector<8x512xf32>
    %c0_25 = arith.constant 0 : index
    %c0_26 = arith.constant 0 : index
    %73 = vector.load %arg2[%c0_25, %c0_26] : memref<128x512xf32, #tpu.memory_space<vmem>>, vector<128x512xf32>
    %cst_27 = arith.constant dense<0.000000e+00> : vector<8x512xf32>
    %74 = tpu.matmul %69, %73, %cst_27 {dimension_numbers = #tpu.dot_dimension_numbers<[1], [0], [0], [1], [0, 0, 1, 1], [], []>} : vector<8x128xf32>, vector<128x512xf32>, vector<8x512xf32> -> vector<8x512xf32>
    %75 = arith.addf %72, %74 : vector<8x512xf32>
    %76 = vector.extract_strided_slice %75 {offsets = [0, 0], sizes = [8, 128], strides = [1, 1]} : vector<8x512xf32> to vector<8x128xf32>
    %77 = arith.negf %76 : vector<8x128xf32>
    %78 = math.exp %77 : vector<8x128xf32>
    %cst_28 = arith.constant 1.000000e+00 : f32
    %79 = vector.broadcast %cst_28 : f32 to vector<8x128xf32>
    %80 = arith.addf %79, %78 : vector<8x128xf32>
    %81 = arith.divf %79, %80 : vector<8x128xf32>
    %82 = vector.extract_strided_slice %75 {offsets = [0, 128], sizes = [8, 128], strides = [1, 1]} : vector<8x512xf32> to vector<8x128xf32>
    %83 = arith.negf %82 : vector<8x128xf32>
    %84 = math.exp %83 : vector<8x128xf32>
    %cst_29 = arith.constant 1.000000e+00 : f32
    %85 = vector.broadcast %cst_29 : f32 to vector<8x128xf32>
    %86 = arith.addf %85, %84 : vector<8x128xf32>
    %87 = arith.divf %85, %86 : vector<8x128xf32>
    %88 = vector.extract_strided_slice %75 {offsets = [0, 256], sizes = [8, 128], strides = [1, 1]} : vector<8x512xf32> to vector<8x128xf32>
    %89 = math.tanh %88 : vector<8x128xf32>
    %90 = vector.extract_strided_slice %75 {offsets = [0, 384], sizes = [8, 128], strides = [1, 1]} : vector<8x512xf32> to vector<8x128xf32>
    %91 = arith.negf %90 : vector<8x128xf32>
    %92 = math.exp %91 : vector<8x128xf32>
    %cst_30 = arith.constant 1.000000e+00 : f32
    %93 = vector.broadcast %cst_30 : f32 to vector<8x128xf32>
    %94 = arith.addf %93, %92 : vector<8x128xf32>
    %95 = arith.divf %93, %94 : vector<8x128xf32>
    %96 = arith.mulf %87, %67 : vector<8x128xf32>
    %97 = arith.mulf %81, %89 : vector<8x128xf32>
    %98 = arith.addf %96, %97 : vector<8x128xf32>
    %99 = math.tanh %98 : vector<8x128xf32>
    %100 = arith.mulf %95, %99 : vector<8x128xf32>
    %c3_i32 = arith.constant 3 : i32
    %c8_i32_31 = arith.constant 8 : i32
    %101 = arith.muli %c3_i32, %c8_i32_31 : i32
    %102 = arith.index_cast %101 : i32 to index
    %c0_32 = arith.constant 0 : index
    %103 = vector.load %arg7[%102, %c0_32] : memref<64x512xf32, #tpu.memory_space<vmem>>, vector<8x512xf32>
    %c0_33 = arith.constant 0 : index
    %c0_34 = arith.constant 0 : index
    %104 = vector.load %arg2[%c0_33, %c0_34] : memref<128x512xf32, #tpu.memory_space<vmem>>, vector<128x512xf32>
    %cst_35 = arith.constant dense<0.000000e+00> : vector<8x512xf32>
    %105 = tpu.matmul %100, %104, %cst_35 {dimension_numbers = #tpu.dot_dimension_numbers<[1], [0], [0], [1], [0, 0, 1, 1], [], []>} : vector<8x128xf32>, vector<128x512xf32>, vector<8x512xf32> -> vector<8x512xf32>
    %106 = arith.addf %103, %105 : vector<8x512xf32>
    %107 = vector.extract_strided_slice %106 {offsets = [0, 0], sizes = [8, 128], strides = [1, 1]} : vector<8x512xf32> to vector<8x128xf32>
    %108 = arith.negf %107 : vector<8x128xf32>
    %109 = math.exp %108 : vector<8x128xf32>
    %cst_36 = arith.constant 1.000000e+00 : f32
    %110 = vector.broadcast %cst_36 : f32 to vector<8x128xf32>
    %111 = arith.addf %110, %109 : vector<8x128xf32>
    %112 = arith.divf %110, %111 : vector<8x128xf32>
    %113 = vector.extract_strided_slice %106 {offsets = [0, 128], sizes = [8, 128], strides = [1, 1]} : vector<8x512xf32> to vector<8x128xf32>
    %114 = arith.negf %113 : vector<8x128xf32>
    %115 = math.exp %114 : vector<8x128xf32>
    %cst_37 = arith.constant 1.000000e+00 : f32
    %116 = vector.broadcast %cst_37 : f32 to vector<8x128xf32>
    %117 = arith.addf %116, %115 : vector<8x128xf32>
    %118 = arith.divf %116, %117 : vector<8x128xf32>
    %119 = vector.extract_strided_slice %106 {offsets = [0, 256], sizes = [8, 128], strides = [1, 1]} : vector<8x512xf32> to vector<8x128xf32>
    %120 = math.tanh %119 : vector<8x128xf32>
    %121 = vector.extract_strided_slice %106 {offsets = [0, 384], sizes = [8, 128], strides = [1, 1]} : vector<8x512xf32> to vector<8x128xf32>
    %122 = arith.negf %121 : vector<8x128xf32>
    %123 = math.exp %122 : vector<8x128xf32>
    %cst_38 = arith.constant 1.000000e+00 : f32
    %124 = vector.broadcast %cst_38 : f32 to vector<8x128xf32>
    %125 = arith.addf %124, %123 : vector<8x128xf32>
    %126 = arith.divf %124, %125 : vector<8x128xf32>
    %127 = arith.mulf %118, %98 : vector<8x128xf32>
    %128 = arith.mulf %112, %120 : vector<8x128xf32>
    %129 = arith.addf %127, %128 : vector<8x128xf32>
    %130 = math.tanh %129 : vector<8x128xf32>
    %131 = arith.mulf %126, %130 : vector<8x128xf32>
    %c4_i32 = arith.constant 4 : i32
    %c8_i32_39 = arith.constant 8 : i32
    %132 = arith.muli %c4_i32, %c8_i32_39 : i32
    %133 = arith.index_cast %132 : i32 to index
    %c0_40 = arith.constant 0 : index
    %134 = vector.load %arg7[%133, %c0_40] : memref<64x512xf32, #tpu.memory_space<vmem>>, vector<8x512xf32>
    %c0_41 = arith.constant 0 : index
    %c0_42 = arith.constant 0 : index
    %135 = vector.load %arg2[%c0_41, %c0_42] : memref<128x512xf32, #tpu.memory_space<vmem>>, vector<128x512xf32>
    %cst_43 = arith.constant dense<0.000000e+00> : vector<8x512xf32>
    %136 = tpu.matmul %131, %135, %cst_43 {dimension_numbers = #tpu.dot_dimension_numbers<[1], [0], [0], [1], [0, 0, 1, 1], [], []>} : vector<8x128xf32>, vector<128x512xf32>, vector<8x512xf32> -> vector<8x512xf32>
    %137 = arith.addf %134, %136 : vector<8x512xf32>
    %138 = vector.extract_strided_slice %137 {offsets = [0, 0], sizes = [8, 128], strides = [1, 1]} : vector<8x512xf32> to vector<8x128xf32>
    %139 = arith.negf %138 : vector<8x128xf32>
    %140 = math.exp %139 : vector<8x128xf32>
    %cst_44 = arith.constant 1.000000e+00 : f32
    %141 = vector.broadcast %cst_44 : f32 to vector<8x128xf32>
    %142 = arith.addf %141, %140 : vector<8x128xf32>
    %143 = arith.divf %141, %142 : vector<8x128xf32>
    %144 = vector.extract_strided_slice %137 {offsets = [0, 128], sizes = [8, 128], strides = [1, 1]} : vector<8x512xf32> to vector<8x128xf32>
    %145 = arith.negf %144 : vector<8x128xf32>
    %146 = math.exp %145 : vector<8x128xf32>
    %cst_45 = arith.constant 1.000000e+00 : f32
    %147 = vector.broadcast %cst_45 : f32 to vector<8x128xf32>
    %148 = arith.addf %147, %146 : vector<8x128xf32>
    %149 = arith.divf %147, %148 : vector<8x128xf32>
    %150 = vector.extract_strided_slice %137 {offsets = [0, 256], sizes = [8, 128], strides = [1, 1]} : vector<8x512xf32> to vector<8x128xf32>
    %151 = math.tanh %150 : vector<8x128xf32>
    %152 = vector.extract_strided_slice %137 {offsets = [0, 384], sizes = [8, 128], strides = [1, 1]} : vector<8x512xf32> to vector<8x128xf32>
    %153 = arith.negf %152 : vector<8x128xf32>
    %154 = math.exp %153 : vector<8x128xf32>
    %cst_46 = arith.constant 1.000000e+00 : f32
    %155 = vector.broadcast %cst_46 : f32 to vector<8x128xf32>
    %156 = arith.addf %155, %154 : vector<8x128xf32>
    %157 = arith.divf %155, %156 : vector<8x128xf32>
    %158 = arith.mulf %149, %129 : vector<8x128xf32>
    %159 = arith.mulf %143, %151 : vector<8x128xf32>
    %160 = arith.addf %158, %159 : vector<8x128xf32>
    %161 = math.tanh %160 : vector<8x128xf32>
    %162 = arith.mulf %157, %161 : vector<8x128xf32>
    %c5_i32 = arith.constant 5 : i32
    %c8_i32_47 = arith.constant 8 : i32
    %163 = arith.muli %c5_i32, %c8_i32_47 : i32
    %164 = arith.index_cast %163 : i32 to index
    %c0_48 = arith.constant 0 : index
    %165 = vector.load %arg7[%164, %c0_48] : memref<64x512xf32, #tpu.memory_space<vmem>>, vector<8x512xf32>
    %c0_49 = arith.constant 0 : index
    %c0_50 = arith.constant 0 : index
    %166 = vector.load %arg2[%c0_49, %c0_50] : memref<128x512xf32, #tpu.memory_space<vmem>>, vector<128x512xf32>
    %cst_51 = arith.constant dense<0.000000e+00> : vector<8x512xf32>
    %167 = tpu.matmul %162, %166, %cst_51 {dimension_numbers = #tpu.dot_dimension_numbers<[1], [0], [0], [1], [0, 0, 1, 1], [], []>} : vector<8x128xf32>, vector<128x512xf32>, vector<8x512xf32> -> vector<8x512xf32>
    %168 = arith.addf %165, %167 : vector<8x512xf32>
    %169 = vector.extract_strided_slice %168 {offsets = [0, 0], sizes = [8, 128], strides = [1, 1]} : vector<8x512xf32> to vector<8x128xf32>
    %170 = arith.negf %169 : vector<8x128xf32>
    %171 = math.exp %170 : vector<8x128xf32>
    %cst_52 = arith.constant 1.000000e+00 : f32
    %172 = vector.broadcast %cst_52 : f32 to vector<8x128xf32>
    %173 = arith.addf %172, %171 : vector<8x128xf32>
    %174 = arith.divf %172, %173 : vector<8x128xf32>
    %175 = vector.extract_strided_slice %168 {offsets = [0, 128], sizes = [8, 128], strides = [1, 1]} : vector<8x512xf32> to vector<8x128xf32>
    %176 = arith.negf %175 : vector<8x128xf32>
    %177 = math.exp %176 : vector<8x128xf32>
    %cst_53 = arith.constant 1.000000e+00 : f32
    %178 = vector.broadcast %cst_53 : f32 to vector<8x128xf32>
    %179 = arith.addf %178, %177 : vector<8x128xf32>
    %180 = arith.divf %178, %179 : vector<8x128xf32>
    %181 = vector.extract_strided_slice %168 {offsets = [0, 256], sizes = [8, 128], strides = [1, 1]} : vector<8x512xf32> to vector<8x128xf32>
    %182 = math.tanh %181 : vector<8x128xf32>
    %183 = vector.extract_strided_slice %168 {offsets = [0, 384], sizes = [8, 128], strides = [1, 1]} : vector<8x512xf32> to vector<8x128xf32>
    %184 = arith.negf %183 : vector<8x128xf32>
    %185 = math.exp %184 : vector<8x128xf32>
    %cst_54 = arith.constant 1.000000e+00 : f32
    %186 = vector.broadcast %cst_54 : f32 to vector<8x128xf32>
    %187 = arith.addf %186, %185 : vector<8x128xf32>
    %188 = arith.divf %186, %187 : vector<8x128xf32>
    %189 = arith.mulf %180, %160 : vector<8x128xf32>
    %190 = arith.mulf %174, %182 : vector<8x128xf32>
    %191 = arith.addf %189, %190 : vector<8x128xf32>
    %192 = math.tanh %191 : vector<8x128xf32>
    %193 = arith.mulf %188, %192 : vector<8x128xf32>
    %c6_i32 = arith.constant 6 : i32
    %c8_i32_55 = arith.constant 8 : i32
    %194 = arith.muli %c6_i32, %c8_i32_55 : i32
    %195 = arith.index_cast %194 : i32 to index
    %c0_56 = arith.constant 0 : index
    %196 = vector.load %arg7[%195, %c0_56] : memref<64x512xf32, #tpu.memory_space<vmem>>, vector<8x512xf32>
    %c0_57 = arith.constant 0 : index
    %c0_58 = arith.constant 0 : index
    %197 = vector.load %arg2[%c0_57, %c0_58] : memref<128x512xf32, #tpu.memory_space<vmem>>, vector<128x512xf32>
    %cst_59 = arith.constant dense<0.000000e+00> : vector<8x512xf32>
    %198 = tpu.matmul %193, %197, %cst_59 {dimension_numbers = #tpu.dot_dimension_numbers<[1], [0], [0], [1], [0, 0, 1, 1], [], []>} : vector<8x128xf32>, vector<128x512xf32>, vector<8x512xf32> -> vector<8x512xf32>
    %199 = arith.addf %196, %198 : vector<8x512xf32>
    %200 = vector.extract_strided_slice %199 {offsets = [0, 0], sizes = [8, 128], strides = [1, 1]} : vector<8x512xf32> to vector<8x128xf32>
    %201 = arith.negf %200 : vector<8x128xf32>
    %202 = math.exp %201 : vector<8x128xf32>
    %cst_60 = arith.constant 1.000000e+00 : f32
    %203 = vector.broadcast %cst_60 : f32 to vector<8x128xf32>
    %204 = arith.addf %203, %202 : vector<8x128xf32>
    %205 = arith.divf %203, %204 : vector<8x128xf32>
    %206 = vector.extract_strided_slice %199 {offsets = [0, 128], sizes = [8, 128], strides = [1, 1]} : vector<8x512xf32> to vector<8x128xf32>
    %207 = arith.negf %206 : vector<8x128xf32>
    %208 = math.exp %207 : vector<8x128xf32>
    %cst_61 = arith.constant 1.000000e+00 : f32
    %209 = vector.broadcast %cst_61 : f32 to vector<8x128xf32>
    %210 = arith.addf %209, %208 : vector<8x128xf32>
    %211 = arith.divf %209, %210 : vector<8x128xf32>
    %212 = vector.extract_strided_slice %199 {offsets = [0, 256], sizes = [8, 128], strides = [1, 1]} : vector<8x512xf32> to vector<8x128xf32>
    %213 = math.tanh %212 : vector<8x128xf32>
    %214 = vector.extract_strided_slice %199 {offsets = [0, 384], sizes = [8, 128], strides = [1, 1]} : vector<8x512xf32> to vector<8x128xf32>
    %215 = arith.negf %214 : vector<8x128xf32>
    %216 = math.exp %215 : vector<8x128xf32>
    %cst_62 = arith.constant 1.000000e+00 : f32
    %217 = vector.broadcast %cst_62 : f32 to vector<8x128xf32>
    %218 = arith.addf %217, %216 : vector<8x128xf32>
    %219 = arith.divf %217, %218 : vector<8x128xf32>
    %220 = arith.mulf %211, %191 : vector<8x128xf32>
    %221 = arith.mulf %205, %213 : vector<8x128xf32>
    %222 = arith.addf %220, %221 : vector<8x128xf32>
    %223 = math.tanh %222 : vector<8x128xf32>
    %224 = arith.mulf %219, %223 : vector<8x128xf32>
    %c7_i32 = arith.constant 7 : i32
    %c8_i32_63 = arith.constant 8 : i32
    %225 = arith.muli %c7_i32, %c8_i32_63 : i32
    %226 = arith.index_cast %225 : i32 to index
    %c0_64 = arith.constant 0 : index
    %227 = vector.load %arg7[%226, %c0_64] : memref<64x512xf32, #tpu.memory_space<vmem>>, vector<8x512xf32>
    %c0_65 = arith.constant 0 : index
    %c0_66 = arith.constant 0 : index
    %228 = vector.load %arg2[%c0_65, %c0_66] : memref<128x512xf32, #tpu.memory_space<vmem>>, vector<128x512xf32>
    %cst_67 = arith.constant dense<0.000000e+00> : vector<8x512xf32>
    %229 = tpu.matmul %224, %228, %cst_67 {dimension_numbers = #tpu.dot_dimension_numbers<[1], [0], [0], [1], [0, 0, 1, 1], [], []>} : vector<8x128xf32>, vector<128x512xf32>, vector<8x512xf32> -> vector<8x512xf32>
    %230 = arith.addf %227, %229 : vector<8x512xf32>
    %231 = vector.extract_strided_slice %230 {offsets = [0, 0], sizes = [8, 128], strides = [1, 1]} : vector<8x512xf32> to vector<8x128xf32>
    %232 = arith.negf %231 : vector<8x128xf32>
    %233 = math.exp %232 : vector<8x128xf32>
    %cst_68 = arith.constant 1.000000e+00 : f32
    %234 = vector.broadcast %cst_68 : f32 to vector<8x128xf32>
    %235 = arith.addf %234, %233 : vector<8x128xf32>
    %236 = arith.divf %234, %235 : vector<8x128xf32>
    %237 = vector.extract_strided_slice %230 {offsets = [0, 128], sizes = [8, 128], strides = [1, 1]} : vector<8x512xf32> to vector<8x128xf32>
    %238 = arith.negf %237 : vector<8x128xf32>
    %239 = math.exp %238 : vector<8x128xf32>
    %cst_69 = arith.constant 1.000000e+00 : f32
    %240 = vector.broadcast %cst_69 : f32 to vector<8x128xf32>
    %241 = arith.addf %240, %239 : vector<8x128xf32>
    %242 = arith.divf %240, %241 : vector<8x128xf32>
    %243 = vector.extract_strided_slice %230 {offsets = [0, 256], sizes = [8, 128], strides = [1, 1]} : vector<8x512xf32> to vector<8x128xf32>
    %244 = math.tanh %243 : vector<8x128xf32>
    %245 = vector.extract_strided_slice %230 {offsets = [0, 384], sizes = [8, 128], strides = [1, 1]} : vector<8x512xf32> to vector<8x128xf32>
    %246 = arith.negf %245 : vector<8x128xf32>
    %247 = math.exp %246 : vector<8x128xf32>
    %cst_70 = arith.constant 1.000000e+00 : f32
    %248 = vector.broadcast %cst_70 : f32 to vector<8x128xf32>
    %249 = arith.addf %248, %247 : vector<8x128xf32>
    %250 = arith.divf %248, %249 : vector<8x128xf32>
    %251 = arith.mulf %242, %222 : vector<8x128xf32>
    %252 = arith.mulf %236, %244 : vector<8x128xf32>
    %253 = arith.addf %251, %252 : vector<8x128xf32>
    %254 = math.tanh %253 : vector<8x128xf32>
    %255 = arith.mulf %250, %254 : vector<8x128xf32>
    %c8_i32_71 = arith.constant 8 : i32
    %c0_72 = arith.constant 0 : index
    %c0_73 = arith.constant 0 : index
    %256 = vector.load %arg4[%c0_72, %c0_73] : memref<128x128xf32, #tpu.memory_space<vmem>>, vector<128x128xf32>
    %cst_74 = arith.constant dense<0.000000e+00> : vector<8x128xf32>
    %257 = tpu.matmul %255, %256, %cst_74 {dimension_numbers = #tpu.dot_dimension_numbers<[1], [0], [0], [1], [0, 0, 1, 1], [], []>} : vector<8x128xf32>, vector<128x128xf32>, vector<8x128xf32> -> vector<8x128xf32>
    %c0_75 = arith.constant 0 : index
    %c0_76 = arith.constant 0 : index
    %258 = vector.load %arg5[%c0_75, %c0_76] : memref<1x128xf32, #tpu.memory_space<vmem>>, vector<1x128xf32>
    %259 = vector.broadcast %258 : vector<1x128xf32> to vector<8x128xf32>
    %260 = arith.addf %257, %259 : vector<8x128xf32>
    %c0_77 = arith.constant 0 : index
    %c0_78 = arith.constant 0 : index
    %261 = vector.load %arg6[%c0_77, %c0_78] : memref<8x128xf32, #tpu.memory_space<vmem>>, vector<8x128xf32>
    tpu.vector_store %arg6[%c0_77, %c0_78], %260 {strides = array<i32>} : memref<8x128xf32, #tpu.memory_space<vmem>>, vector<8x128xf32>,
    return
  }
}

</mosaic_0001>

<bundles_post_ra>
// kernel: tpu_custom_call.1
= control target key start
LH: loop header
LB: loop body
LE: loop exit
PB: predicated region body
PF: predicated region fallthrough
CT: control target
= control target key end

     0   :  { %11 = vsyncpa [#allocation4], 0  ;;  %s3089_s0 = inlined_call_operand.vmem [shape: f32[64,28], index: 0, kind: input, shape index: {}]   ;;  %s3090_s1 = inlined_call_operand.hbm [shape: f32[28,512], index: 1, kind: input, shape index: {}]   ;;  %s3091_s2 = inlined_call_operand.hbm [shape: f32[128,512], index: 2, kind: input, shape index: {}]   ;;  %s3092_s3 = inlined_call_operand.vmem [shape: f32[1,512], index: 3, kind: input, shape index: {}]   ;;  %s3093_s4 = inlined_call_operand.hbm [shape: f32[128,128], index: 4, kind: input, shape index: {}]   ;;  %s3094_s5 = inlined_call_operand.vmem [shape: f32[1,128], index: 5, kind: input, shape index: {}]   ;;  %s3095_s6 = inlined_call_operand.hbm [shape: f32[8,128], index: 6, kind: output, shape index: {}]  }
   0x1   :  { %12 = vsyncpa [#allocation7], 0 }
   0x2   :  { %13 = vsyncpa [#allocation5], 0  ;;  %s33_s23 = sshll.u32 %s3091_s2, 4  ;;  %s2046_s24 = smov [#allocation6]   ;;  %s34_s23 = int_to_ptr.hbm [resolvable:$true] %s33_s23 }
   0x3   :  { %s35_s25 = sshll.u32 %s2046_s24, 4  ;;  %s20_s28 = sshll.u32 %s3090_s1, 4  ;;  %s36_s25 = int_to_ptr.vmem [resolvable:$true] %s35_s25  ;;  %s21_s28 = int_to_ptr.hbm [resolvable:$true] %s20_s28 }
   0x4   :  { %s2047_s29 = smov 512   ;;  %s2048_s30 = smov 32  }
   0x5   :  { %41 = dma.hbm_to_vmem [thread:$0]  %s34_s23, 8192, %s36_s25, [#allocation7], %s2047_s29, %s2047_s29, %s2048_s30  }
   0x6   :  { %s2049_s7 = smov [#allocation3]   ;;  %s48_s11 = sshll.u32 %s3093_s4, 4  ;;  %s49_s11 = int_to_ptr.hbm [resolvable:$true] %s48_s11 }
   0x7   :  { %s22_s8 = sshll.u32 %s2049_s7, 4  ;;  %s2050_s2 = smov [#allocation8]   ;;  %s23_s8 = int_to_ptr.vmem [resolvable:$true] %s22_s8 }
   0x8   :  { %28 = dma.hbm_to_vmem [thread:$0]  %s21_s28, 2048, %s23_s8, [#allocation4], %s2047_s29, %s2047_s29, %s2048_s30  }
   0x9   :  { %s50_s12 = sshll.u32 %s2050_s2, 4  ;;  %s2051_s13 = smov 128   ;;  %s51_s12 = int_to_ptr.vmem [resolvable:$true] %s50_s12 }
   0xa   :  { %s2052_s14 = smov 8  }
   0xb   :  { %56 = dma.hbm_to_vmem [thread:$0]  %s49_s11, 2048, %s51_s12, [#allocation7], %s2051_s13, %s2051_s13, %s2052_s14  }
   0xc   :  { %2040 = dma.done.wait [#allocation4], 2048  }
   0xd   :  { %2041 = vsyncadd [#allocation4], 4294965248 }
   0xe   :  { %2042 = dma.done.wait [#allocation7], 10240  }
   0xf   :  { %2043 = vsyncadd [#allocation7], 4294957056  ;;  %vm130_vm0 = vcmask 1043456   ;;  %v91_v0 = vld [vmem:[#allocation3 + $0x60] sm:$0xf]  ;;  %vm105_vm1 = vcmask 228352  }
  0x10   :  { %v87_v1 = vld [vmem:[#allocation3 + $0x40] sm:$0xff]  ;;  %1670 = vmatpush.msk.msra.mxu0 %vm130_vm0, %v91_v0  ;;  %1730 = vmatpush.msk.msra.mxu1 %vm130_vm0, %v91_v0  ;;  %v2109_v5 = vld [vmem:[%s3089_s0 + $0x28] sm:$0xff]  ;;  %v2114_v6 = vld [vmem:[%s3089_s0 + $0x30] sm:$0xff]  ;;  %s2054_s7 = smov [#allocation9]   ;;  %s1659_s11 = sshll.u32 %s3095_s6, 4  ;;  %s1660_s11 = int_to_ptr.hbm [resolvable:$true] %s1659_s11 }
  0x11   :  { %1731 = vmatpush.msk.msra.mxu2 %vm130_vm0, %v91_v0  ;;  %1732 = vmatpush.msk.msra.mxu3 %vm130_vm0, %v91_v0  ;;  %v83_v2 = vld [vmem:[#allocation3 + $0x20] sm:$0xff]  ;;  %v2119_v7 = vld [vmem:[%s3089_s0 + $0x38] sm:$0xff]  ;;  %v92_v8 = vld [vmem:[#allocation3 + $0x68] sm:$0xf]  ;;  %s1657_s8 = sshll.u32 %s2054_s7, 4  ;;  %s1658_s8 = int_to_ptr.vmem [resolvable:$true] %s1657_s8 }
  0x12   :  { %156 = vmatpush.msra.mxu0 %v87_v1  ;;  %1733 = vmatpush.msra.mxu1 %v87_v1  ;;  %v79_v3 = vld [vmem:[#allocation3] sm:$0xff]  ;;  %v93_v9 = vld [vmem:[#allocation3 + $0x70] sm:$0xf]  ;;  %v94_v10 = vld [vmem:[#allocation3 + $0x78] sm:$0xf] }
  0x13   :  { %1734 = vmatpush.msra.mxu2 %v87_v1  ;;  %1735 = vmatpush.msra.mxu3 %v87_v1  ;;  %v71_v4 = vld [vmem:[%s3089_s0] sm:$0xff]  ;;  %v88_v12 = vld [vmem:[#allocation3 + $0x48] sm:$0xff]  ;;  %v89_v13 = vld [vmem:[#allocation3 + $0x50] sm:$0xff] }
  0x14   :  { %157 = vmatpush.msra.mxu0 %v83_v2  ;;  %1736 = vmatpush.msra.mxu1 %v83_v2  ;;  %v2124_v11 = vld [vmem:[#allocation6 + $0x1e0] sm:$0xff]  ;;  %v90_v14 = vld [vmem:[#allocation3 + $0x58] sm:$0xff]  ;;  %v84_v16 = vld [vmem:[#allocation3 + $0x28] sm:$0xff] }
  0x15   :  { %1737 = vmatpush.msra.mxu2 %v83_v2  ;;  %1738 = vmatpush.msra.mxu3 %v83_v2  ;;  %3196 = vst [vmem:[#allocation13_spill] sm:$0xff] %v2124_v11  ;;  %v2132_v15 = vld [vmem:[#allocation6 + $0x1c0] sm:$0xff]  ;;  %v85_v17 = vld [vmem:[#allocation3 + $0x30] sm:$0xff]  ;;  %v86_v18 = vld [vmem:[#allocation3 + $0x38] sm:$0xff] }
  0x16   :  { %158 = vmatpush.msra.mxu0 %v79_v3  ;;  %1739 = vmatpush.msra.mxu1 %v79_v3  ;;  %v2136_v19 = vld [vmem:[#allocation6 + $0x1a0] sm:$0xff]  ;;  %v80_v20 = vld [vmem:[#allocation3 + $0x8] sm:$0xff]  ;;  %v81_v21 = vld [vmem:[#allocation3 + $0x10] sm:$0xff] }
  0x17   :  { %1740 = vmatpush.msra.mxu2 %v79_v3  ;;  %1741 = vmatpush.msra.mxu3 %v79_v3  ;;  %v82_v22 = vld [vmem:[#allocation3 + $0x18] sm:$0xff]  ;;  %v72_v23 = vld [vmem:[%s3089_s0 + $0x8] sm:$0xff]  ;;  %v2148_v26 = vld [vmem:[#allocation6 + $0x180] sm:$0xff] }
  0x18   :  { %1671 = vmatmul.msk.f32.vlgmr.msra.gmra.mxu0 %vm105_vm1, %v71_v4  ;;  %1676 = vmatmul.msk.f32.vlgmr.msra.gmra.mxu1 %vm105_vm1, %v2109_v5  ;;  %v2143_v24 = vld [vmem:[#allocation6 + $0x1e8] sm:$0xff]  ;;  %v2146_v25 = vld [vmem:[#allocation6 + $0x1f8] sm:$0xff]  ;;  %v2154_v28 = vld [vmem:[#allocation6 + $0x1f0] sm:$0xff] }
  0x19   :  { %1677 = vmatmul.msk.f32.vlgmr.msra.gmra.mxu2 %vm105_vm1, %v2114_v6  ;;  %1678 = vmatmul.msk.f32.vlgmr.msra.gmra.mxu3 %vm105_vm1, %v2119_v7  ;;  %v2152_v27 = vld [vmem:[#allocation6 + $0x1c8] sm:$0xff]  ;;  %v2158_v29 = vld [vmem:[#allocation6 + $0x160] sm:$0xff]  ;;  %v2160_v30 = vld [vmem:[#allocation6 + $0x1d8] sm:$0xff] }
  0x1a   :  { %1679 = vmatpush.msk.msrb.mxu1 %vm130_vm0, %v92_v8  ;;  %1688 = vmatpush.msk.msrb.mxu2 %vm130_vm0, %v93_v9  ;;  %v2164_v31 = vld [vmem:[#allocation6 + $0x1a8] sm:$0xff]  ;;  %v2166_v32 = vld [vmem:[#allocation6 + $0x1d0] sm:$0xff]  ;;  %v2169_v33 = vld [vmem:[#allocation6 + $0x140] sm:$0xff] }
  0x1b   :  { %1697 = vmatpush.msk.msrb.mxu3 %vm130_vm0, %v94_v10  ;;  %407 = vmatpush.msrb.mxu0 %v2124_v11  ;;  %v2171_v34 = vld [vmem:[#allocation6 + $0x1b8] sm:$0xff]  ;;  %v73_v35 = vld [vmem:[%s3089_s0 + $0x10] sm:$0xff]  ;;  %v2179_v36 = vld [vmem:[#allocation6 + $0x188] sm:$0xff] }
  0x1c   :  { %197 = vmatpush.msrb.mxu1 %v88_v12  ;;  %238 = vmatpush.msrb.mxu2 %v89_v13  ;;  %v2184_v37 = vld [vmem:[#allocation6 + $0x120] sm:$0xff]  ;;  %v2189_v38 = vld [vmem:[#allocation6 + $0x168] sm:$0xff]  ;;  %v2191_v39 = vld [vmem:[#allocation6 + $0x198] sm:$0xff] }
  0x1d   :  { %279 = vmatpush.msrb.mxu3 %v90_v14  ;;  %408 = vmatpush.msrb.mxu0 %v2132_v15  ;;  %v2195_v40 = vld [vmem:[#allocation6 + $0x100] sm:$0xff]  ;;  %v2197_v41 = vld [vmem:[#allocation6 + $0x1b0] sm:$0xff]  ;;  %v2201_v42 = vld [vmem:[#allocation6 + $0x148] sm:$0xff] }
  0x1e   :  { %198 = vmatpush.msrb.mxu1 %v84_v16  ;;  %239 = vmatpush.msrb.mxu2 %v85_v17  ;;  %v2203_v43 = vld [vmem:[#allocation6 + $0x178] sm:$0xff]  ;;  %v2206_v44 = vld [vmem:[#allocation6 + $0xe0] sm:$0xff]  ;;  %v2209_v45 = vld [vmem:[#allocation6 + $0x190] sm:$0xff] }
  0x1f   :  { %280 = vmatpush.msrb.mxu3 %v86_v18  ;;  %409 = vmatpush.msrb.mxu0 %v2136_v19  ;;  %v2213_v46 = vld [vmem:[#allocation6 + $0x128] sm:$0xff]  ;;  %v2215_v47 = vld [vmem:[#allocation6 + $0x158] sm:$0xff]  ;;  %v2222_v49 = vld [vmem:[#allocation6 + $0x170] sm:$0xff] }
  0x20   :  { %199 = vmatpush.msrb.mxu1 %v80_v20  ;;  %240 = vmatpush.msrb.mxu2 %v81_v21  ;;  %v74_v48 = vld [vmem:[%s3089_s0 + $0x18] sm:$0xff]  ;;  %v2226_v50 = vld [vmem:[#allocation6 + $0xc0] sm:$0xff]  ;;  %v2231_v51 = vld [vmem:[#allocation6 + $0x108] sm:$0xff]  ;;  %v3098_v21 = vmov 0.0  }
  0x21   :  { %281 = vmatpush.msrb.mxu3 %v82_v22  ;;  %1672 = vmatmul.msk.f32.gmra.mxu0 %vm105_vm1, %v72_v23  ;;  %v2233_v52 = vld [vmem:[#allocation6 + $0x138] sm:$0xff]  ;;  %v2238_v53 = vld [vmem:[#allocation6 + $0xa0] sm:$0xff]  ;;  %v2240_v54 = vld [vmem:[#allocation6 + $0x150] sm:$0xff] }
  0x22   :  { %1680 = vmatmul.msk.f32.vlgmr.msrb.gmra.mxu1 %vm105_vm1, %v71_v4  ;;  %1689 = vmatmul.msk.f32.vlgmr.msrb.gmra.mxu2 %vm105_vm1, %v71_v4  ;;  %3197 = vst [vmem:[#allocation14_spill] sm:$0xff] %v2238_v53  ;;  %v2244_v55 = vld [vmem:[#allocation6 + $0xe8] sm:$0xff]  ;;  %v2246_v56 = vld [vmem:[#allocation6 + $0x118] sm:$0xff]  ;;  %v2248_v57 = vld [vmem:[#allocation6 + $0x80] sm:$0xff] }
  0x23   :  { %1698 = vmatmul.msk.f32.vlgmr.msrb.gmra.mxu3 %vm105_vm1, %v71_v4  ;;  %427 = vmatpush.msra.mxu1 %v2143_v24  ;;  %3198 = vst [vmem:[#allocation15_spill] sm:$0xff] %v2248_v57  ;;  %v2252_v58 = vld [vmem:[#allocation6 + $0x130] sm:$0xff]  ;;  %v2256_v59 = vld [vmem:[#allocation6 + $0xc8] sm:$0xff]  ;;  %v2258_v60 = vld [vmem:[#allocation6 + $0xf8] sm:$0xff] }
  0x24   :  { %467 = vmatpush.msra.mxu3 %v2146_v25  ;;  %410 = vmatpush.msrb.mxu0 %v2148_v26  ;;  %v75_v61 = vld [vmem:[%s3089_s0 + $0x20] sm:$0xff]  ;;  %v2265_v62 = vld [vmem:[#allocation6 + $0x110] sm:$0xff]  ;;  %v2274_v0 = vld [vmem:[#allocation6 + $0xa8] sm:$0xff] }
  0x25   :  { %428 = vmatpush.msra.mxu1 %v2152_v27  ;;  %447 = vmatpush.msra.mxu2 %v2154_v28  ;;  %v2269_v63 = vld [vmem:[#allocation6 + $0x60] sm:$0xff]  ;;  %3200 = vst [vmem:[#allocation17_spill] sm:$0xff] %v2274_v0  ;;  %v2276_v1 = vld [vmem:[#allocation6 + $0xd8] sm:$0xff]  ;;  %v2283_v3 = vld [vmem:[#allocation6 + $0xf0] sm:$0xff] }
  0x26   :  { %411 = vmatpush.msrb.mxu0 %v2158_v29  ;;  %468 = vmatpush.msra.mxu3 %v2160_v30  ;;  %3199 = vst [vmem:[#allocation16_spill] sm:$0xff] %v2269_v63  ;;  %v2281_v2 = vld [vmem:[#allocation6 + $0x40] sm:$0xff]  ;;  %v2287_v4 = vld [vmem:[#allocation6 + $0x88] sm:$0xff]  ;;  %v2289_v8 = vld [vmem:[#allocation6 + $0xb8] sm:$0xff] }
  0x27   :  { %429 = vmatpush.msra.mxu1 %v2164_v31  ;;  %448 = vmatpush.msra.mxu2 %v2166_v32  ;;  %3201 = vst [vmem:[#allocation18_spill] sm:$0xff] %v2276_v1  ;;  %v2291_v9 = vld [vmem:[#allocation6 + $0x20] sm:$0xff]  ;;  %v2295_v10 = vld [vmem:[#allocation6 + $0xd0] sm:$0xff]  ;;  %v2299_v12 = vld [vmem:[#allocation6 + $0x68] sm:$0xff] }
  0x28   :  { %412 = vmatpush.msrb.mxu0 %v2169_v33  ;;  %469 = vmatpush.msra.mxu3 %v2171_v34  ;;  %3202 = vst [vmem:[#allocation19_spill] sm:$0xff] %v2281_v2  ;;  %v2301_v13 = vld [vmem:[#allocation6 + $0x98] sm:$0xff]  ;;  %v2303_v14 = vld [vmem:[#allocation6] sm:$0xff]  ;;  %v2307_v16 = vld [vmem:[#allocation6 + $0xb0] sm:$0xff] }
  0x29   :  { %1673 = vmatmul.msk.f32.gmra.mxu0 %vm105_vm1, %v73_v35  ;;  %430 = vmatpush.msra.mxu1 %v2179_v36  ;;  %3203 = vst [vmem:[#allocation20_spill] sm:$0xff] %v2287_v4  ;;  %v2314_v17 = vld [vmem:[#allocation6 + $0x48] sm:$0xff]  ;;  %v2317_v18 = vld [vmem:[#allocation6 + $0x78] sm:$0xff]  ;;  %v2321_v20 = vld [vmem:[#allocation6 + $0x90] sm:$0xff] }
  0x2a   :  { %1681 = vmatmul.msk.f32.gmra.mxu1 %vm105_vm1, %v72_v23  ;;  %1690 = vmatmul.msk.f32.gmra.mxu2 %vm105_vm1, %v72_v23  ;;  %3204 = vst [vmem:[#allocation21_spill] sm:$0xff] %v2289_v8  ;;  %v2325_v22 = vld [vmem:[#allocation6 + $0x28] sm:$0xff] }
  0x2b   :  { %1699 = vmatmul.msk.f32.gmra.mxu3 %vm105_vm1, %v72_v23  ;;  %413 = vmatpush.msrb.mxu0 %v2184_v37  ;;  %3205 = vst [vmem:[#allocation22_spill] sm:$0xff] %v2291_v9  ;;  %v2327_v23 = vld [vmem:[#allocation6 + $0x58] sm:$0xff] }
  0x2c   :  { %431 = vmatpush.msra.mxu1 %v2189_v38  ;;  %470 = vmatpush.msra.mxu3 %v2191_v39  ;;  %3206 = vst [vmem:[#allocation23_spill] sm:$0xff] %v2295_v10 }
  0x2d   :  { %414 = vmatpush.msrb.mxu0 %v2195_v40  ;;  %449 = vmatpush.msra.mxu2 %v2197_v41  ;;  %3207 = vst [vmem:[#allocation24_spill] sm:$0xff] %v2299_v12 }
  0x2e   :  { %432 = vmatpush.msra.mxu1 %v2201_v42  ;;  %471 = vmatpush.msra.mxu3 %v2203_v43  ;;  %3208 = vst [vmem:[#allocation25_spill] sm:$0xff] %v2301_v13 }
  0x2f   :  { %415 = vmatpush.msrb.mxu0 %v2206_v44  ;;  %450 = vmatpush.msra.mxu2 %v2209_v45  ;;  %3209 = vst [vmem:[#allocation26_spill] sm:$0xff] %v2303_v14 }
  0x30   :  { %433 = vmatpush.msra.mxu1 %v2213_v46  ;;  %472 = vmatpush.msra.mxu3 %v2215_v47  ;;  %3210 = vst [vmem:[#allocation27_spill] sm:$0xff] %v2307_v16 }
  0x31   :  { %1674 = vmatmul.msk.f32.gmra.mxu0 %vm105_vm1, %v74_v48  ;;  %451 = vmatpush.msra.mxu2 %v2222_v49  ;;  %3211 = vst [vmem:[#allocation28_spill] sm:$0xff] %v2314_v17 }
  0x32   :  { %1682 = vmatmul.msk.f32.gmra.mxu1 %vm105_vm1, %v73_v35  ;;  %1691 = vmatmul.msk.f32.gmra.mxu2 %vm105_vm1, %v73_v35  ;;  %3212 = vst [vmem:[#allocation29_spill] sm:$0xff] %v2317_v18 }
  0x33   :  { %1700 = vmatmul.msk.f32.gmra.mxu3 %vm105_vm1, %v73_v35  ;;  %416 = vmatpush.msrb.mxu0 %v2226_v50  ;;  %3213 = vst [vmem:[#allocation30_spill] sm:$0xff] %v2321_v20  ;;  %v2331_v35 = vld [vmem:[#allocation6 + $0x70] sm:$0xff] }
  0x34   :  { %434 = vmatpush.msra.mxu1 %v2231_v51  ;;  %473 = vmatpush.msra.mxu3 %v2233_v52  ;;  %3214 = vst [vmem:[#allocation31_spill] sm:$0xff] %v2325_v22 }
  0x35   :  { %417 = vmatpush.msrb.mxu0 %v2238_v53  ;;  %452 = vmatpush.msra.mxu2 %v2240_v54  ;;  %3215 = vst [vmem:[#allocation32_spill] sm:$0xff] %v2327_v23 }
  0x36   :  { %435 = vmatpush.msra.mxu1 %v2244_v55  ;;  %474 = vmatpush.msra.mxu3 %v2246_v56  ;;  %3216 = vst [vmem:[#allocation33_spill] sm:$0xff] %v2331_v35 }
  0x37   :  { %418 = vmatpush.msrb.mxu0 %v2248_v57  ;;  %453 = vmatpush.msra.mxu2 %v2252_v58 }
  0x38   :  { %436 = vmatpush.msra.mxu1 %v2256_v59  ;;  %475 = vmatpush.msra.mxu3 %v2258_v60 }
  0x39   :  { %1675 = vmatmul.msk.f32.gmra.mxu0 %vm105_vm1, %v75_v61  ;;  %454 = vmatpush.msra.mxu2 %v2265_v62 }
  0x3a   :  { %1683 = vmatmul.msk.f32.gmra.mxu1 %vm105_vm1, %v74_v48  ;;  %1692 = vmatmul.msk.f32.gmra.mxu2 %vm105_vm1, %v74_v48 }
  0x3b   :  { %1701 = vmatmul.msk.f32.gmra.mxu3 %vm105_vm1, %v74_v48  ;;  %419 = vmatpush.msrb.mxu0 %v2269_v63  ;;  %v2334_v48 = vld [vmem:[#allocation6 + $0x8] sm:$0xff] }
  0x3c   :  { %437 = vmatpush.msra.mxu1 %v2274_v0  ;;  %476 = vmatpush.msra.mxu3 %v2276_v1  ;;  %3217 = vst [vmem:[#allocation34_spill] sm:$0xff] %v2334_v48 }
  0x3d   :  { %420 = vmatpush.msrb.mxu0 %v2281_v2  ;;  %455 = vmatpush.msra.mxu2 %v2283_v3 }
  0x3e   :  { %438 = vmatpush.msra.mxu1 %v2287_v4  ;;  %477 = vmatpush.msra.mxu3 %v2289_v8 }
  0x3f   :  { %421 = vmatpush.msrb.mxu0 %v2291_v9  ;;  %456 = vmatpush.msra.mxu2 %v2295_v10  ;;  %v2350_v9 = vld [vmem:[#allocation6 + $0x18] sm:$0xff] }
  0x40   :  { %439 = vmatpush.msra.mxu1 %v2299_v12  ;;  %478 = vmatpush.msra.mxu3 %v2301_v13  ;;  %3221 = vst [vmem:[#allocation38_spill] sm:$0xff] %v2350_v9 }
  0x41   :  { %422 = vmatpush.msrb.mxu0 %v2303_v14  ;;  %457 = vmatpush.msra.mxu2 %v2307_v16  ;;  %v2336_v14 = vld [vmem:[#allocation6 + $0x38] sm:$0xff] }
  0x42   :  { %1684 = vmatmul.msk.f32.gmra.mxu1 %vm105_vm1, %v75_v61  ;;  %1693 = vmatmul.msk.f32.gmra.mxu2 %vm105_vm1, %v75_v61  ;;  %3218 = vst [vmem:[#allocation35_spill] sm:$0xff] %v2336_v14 }
  0x43   :  { %1702 = vmatmul.msk.f32.gmra.mxu3 %vm105_vm1, %v75_v61  ;;  %423 = vmatmul.f32.vlgmr.msrb.gmra.mxu0 %v3098_v21  ;;  %v2341_v61 = vld [vmem:[#allocation6 + $0x50] sm:$0xff] }
  0x44   :  { %440 = vmatpush.msra.mxu1 %v2314_v17  ;;  %479 = vmatpush.msra.mxu3 %v2317_v18  ;;  %3219 = vst [vmem:[#allocation36_spill] sm:$0xff] %v2341_v61  ;;  %v2346_v21 = vld [vmem:[#allocation6 + $0x30] sm:$0xff] }
  0x45   :  { %458 = vmatpush.msra.mxu2 %v2321_v20  ;;  %558 = vmatpush.msra.mxu0 %v2124_v11  ;;  %3220 = vst [vmem:[#allocation37_spill] sm:$0xff] %v2346_v21  ;;  %v2357_v11 = vld [vmem:[#allocation6 + $0x10] sm:$0xff] }
  0x46   :  { %441 = vmatpush.msra.mxu1 %v2325_v22  ;;  %480 = vmatpush.msra.mxu3 %v2327_v23  ;;  %3222 = vst [vmem:[#allocation39_spill] sm:$0xff] %v2357_v11 }
  0x47   :  { %459 = vmatpush.msra.mxu2 %v2331_v35  ;;  %559 = vmatpush.msra.mxu0 %v2132_v15 }
  0x48   :  { %442 = vmatpush.msra.mxu1 %v2334_v48  ;;  %481 = vmatpush.msra.mxu3 %v2336_v14 }
  0x49   :  { %460 = vmatpush.msra.mxu2 %v2341_v61  ;;  %560 = vmatpush.msra.mxu0 %v2136_v19 }
  0x4a   :  { %578 = vmatpush.msrb.mxu1 %v2143_v24  ;;  %1694 = vmatmul.msk.f32.gmra.mxu2 %vm105_vm1, %v2109_v5 }
  0x4b   :  { %1685 = vmatmul.msk.f32.gmra.mxu1 %vm105_vm1, %v2109_v5  ;;  %1703 = vmatmul.msk.f32.gmra.mxu3 %vm105_vm1, %v2109_v5  ;;  %v3223_v5 = vmov 0.0  }
  0x4c   :  { %461 = vmatpush.msra.mxu2 %v2346_v21  ;;  %482 = vmatpush.msra.mxu3 %v2350_v9 }
  0x4d   :  { %579 = vmatpush.msrb.mxu1 %v2152_v27  ;;  %561 = vmatpush.msra.mxu0 %v2148_v26 }
  0x4e   :  { %462 = vmatpush.msra.mxu2 %v2357_v11  ;;  %618 = vmatpush.msrb.mxu3 %v2146_v25 }
  0x4f   :  { %580 = vmatpush.msrb.mxu1 %v2164_v31  ;;  %562 = vmatpush.msra.mxu0 %v2158_v29 }
  0x50   :  { %598 = vmatpush.msrb.mxu2 %v2154_v28  ;;  %619 = vmatpush.msrb.mxu3 %v2160_v30 }
  0x51   :  { %581 = vmatpush.msrb.mxu1 %v2179_v36  ;;  %563 = vmatpush.msra.mxu0 %v2169_v33 }
  0x52   :  { %599 = vmatpush.msrb.mxu2 %v2166_v32  ;;  %620 = vmatpush.msrb.mxu3 %v2171_v34 }
  0x53   :  { %1686 = vmatmul.msk.f32.gmra.mxu1 %vm105_vm1, %v2114_v6  ;;  %1695 = vmatmul.msk.f32.gmra.mxu2 %vm105_vm1, %v2114_v6 }
  0x54   :  { %1704 = vmatmul.msk.f32.gmra.mxu3 %vm105_vm1, %v2114_v6  ;;  %600 = vmatpush.msrb.mxu2 %v2197_v41  ;;  %v3224_v6 = vld [vmem:[#allocation22_spill] sm:$0xff] }
  0x55   :  { %621 = vmatpush.msrb.mxu3 %v2191_v39  ;;  %582 = vmatpush.msrb.mxu1 %v2189_v38 }
  0x56   :  { %601 = vmatpush.msrb.mxu2 %v2209_v45  ;;  %564 = vmatpush.msra.mxu0 %v2184_v37 }
  0x57   :  { %622 = vmatpush.msrb.mxu3 %v2203_v43  ;;  %583 = vmatpush.msrb.mxu1 %v2201_v42 }
  0x58   :  { %602 = vmatpush.msrb.mxu2 %v2222_v49  ;;  %565 = vmatpush.msra.mxu0 %v2195_v40 }
  0x59   :  { %623 = vmatpush.msrb.mxu3 %v2215_v47  ;;  %584 = vmatpush.msrb.mxu1 %v2213_v46 }
  0x5a   :  { %603 = vmatpush.msrb.mxu2 %v2240_v54  ;;  %566 = vmatpush.msra.mxu0 %v2206_v44 }
  0x5b   :  { %1687 = vmatmul.msk.f32.gmra.mxu1 %vm105_vm1, %v2119_v7  ;;  %1696 = vmatmul.msk.f32.gmra.mxu2 %vm105_vm1, %v2119_v7 }
  0x5c   :  { %1705 = vmatmul.msk.f32.gmra.mxu3 %vm105_vm1, %v2119_v7  ;;  %604 = vmatpush.msrb.mxu2 %v2252_v58  ;;  %v3225_v7 = vld [vmem:[#allocation26_spill] sm:$0xff] }
  0x5d   :  { %624 = vmatpush.msrb.mxu3 %v2233_v52  ;;  %585 = vmatpush.msrb.mxu1 %v2231_v51 }
  0x5e   :  { %605 = vmatpush.msrb.mxu2 %v2265_v62  ;;  %567 = vmatpush.msra.mxu0 %v2226_v50 }
  0x5f   :  { %625 = vmatpush.msrb.mxu3 %v2246_v56  ;;  %586 = vmatpush.msrb.mxu1 %v2244_v55 }
  0x60   :  { %606 = vmatpush.msrb.mxu2 %v2283_v3  ;;  %568 = vmatpush.msra.mxu0 %v2238_v53 }
  0x61   :  { %626 = vmatpush.msrb.mxu3 %v2258_v60  ;;  %587 = vmatpush.msrb.mxu1 %v2256_v59 }
  0x62   :  { %607 = vmatpush.msrb.mxu2 %v2295_v10  ;;  %569 = vmatpush.msra.mxu0 %v2248_v57 }
  0x63   :  { %443 = vmatmul.f32.vlgmr.msra.gmra.mxu1 %v3223_v5  ;;  %463 = vmatmul.f32.vlgmr.msra.gmra.mxu2 %v3223_v5 }
  0x64   :  { %483 = vmatmul.f32.vlgmr.msra.gmra.mxu3 %v3223_v5  ;;  %588 = vmatpush.msrb.mxu1 %v2274_v0  ;;  %v3226_v5 = vld [vmem:[#allocation13_spill] sm:$0xff] }
  0x65   :  { %627 = vmatpush.msrb.mxu3 %v2276_v1  ;;  %608 = vmatpush.msrb.mxu2 %v2307_v16 }
  0x66   :  { %589 = vmatpush.msrb.mxu1 %v2287_v4  ;;  %570 = vmatpush.msra.mxu0 %v2269_v63 }
  0x67   :  { %628 = vmatpush.msrb.mxu3 %v2289_v8  ;;  %609 = vmatpush.msrb.mxu2 %v2321_v20 }
  0x68   :  { %590 = vmatpush.msrb.mxu1 %v2299_v12  ;;  %571 = vmatpush.msra.mxu0 %v2281_v2 }
  0x69   :  { %629 = vmatpush.msrb.mxu3 %v2301_v13  ;;  %610 = vmatpush.msrb.mxu2 %v2331_v35 }
  0x6a   :  { %591 = vmatpush.msrb.mxu1 %v2314_v17  ;;  %572 = vmatpush.msra.mxu0 %v3224_v6 }
  0x6b   :  { %630 = vmatpush.msrb.mxu3 %v2317_v18  ;;  %611 = vmatpush.msrb.mxu2 %v2341_v61 }
  0x6c   :  { %592 = vmatpush.msrb.mxu1 %v2325_v22  ;;  %573 = vmatpush.msra.mxu0 %v3225_v7 }
  0x6d   :  { %631 = vmatpush.msrb.mxu3 %v2327_v23  ;;  %612 = vmatpush.msrb.mxu2 %v2346_v21 }
  0x6e   :  { %593 = vmatpush.msrb.mxu1 %v2334_v48  ;;  %709 = vmatpush.msrb.mxu0 %v3226_v5 }
  0x6f   :  { %632 = vmatpush.msrb.mxu3 %v2336_v14  ;;  %613 = vmatpush.msrb.mxu2 %v2357_v11 }
  0x70   :  { %729 = vmatpush.msra.mxu1 %v2143_v24  ;;  %710 = vmatpush.msrb.mxu0 %v2132_v15 }
  0x71   :  { %633 = vmatpush.msrb.mxu3 %v2350_v9  ;;  %749 = vmatpush.msra.mxu2 %v2154_v28 }
  0x72   :  { %730 = vmatpush.msra.mxu1 %v2152_v27  ;;  %711 = vmatpush.msrb.mxu0 %v2136_v19 }
  0x73   :  { %769 = vmatpush.msra.mxu3 %v2146_v25  ;;  %750 = vmatpush.msra.mxu2 %v2166_v32 }
  0x74   :  { %731 = vmatpush.msra.mxu1 %v2164_v31  ;;  %712 = vmatpush.msrb.mxu0 %v2148_v26 }
  0x75   :  { %770 = vmatpush.msra.mxu3 %v2160_v30  ;;  %751 = vmatpush.msra.mxu2 %v2197_v41 }
  0x76   :  { %732 = vmatpush.msra.mxu1 %v2179_v36  ;;  %713 = vmatpush.msrb.mxu0 %v2158_v29 }
  0x77   :  { %771 = vmatpush.msra.mxu3 %v2171_v34  ;;  %752 = vmatpush.msra.mxu2 %v2209_v45 }
  0x78   :  { %733 = vmatpush.msra.mxu1 %v2189_v38  ;;  %714 = vmatpush.msrb.mxu0 %v2169_v33 }
  0x79   :  { %772 = vmatpush.msra.mxu3 %v2191_v39  ;;  %753 = vmatpush.msra.mxu2 %v2222_v49 }
  0x7a   :  { %734 = vmatpush.msra.mxu1 %v2201_v42  ;;  %715 = vmatpush.msrb.mxu0 %v2184_v37 }
  0x7b   :  { %773 = vmatpush.msra.mxu3 %v2203_v43  ;;  %754 = vmatpush.msra.mxu2 %v2240_v54 }
  0x7c   :  { %735 = vmatpush.msra.mxu1 %v2213_v46  ;;  %716 = vmatpush.msrb.mxu0 %v2195_v40 }
  0x7d   :  { %774 = vmatpush.msra.mxu3 %v2215_v47  ;;  %755 = vmatpush.msra.mxu2 %v2252_v58 }
  0x7e   :  { %736 = vmatpush.msra.mxu1 %v2231_v51  ;;  %717 = vmatpush.msrb.mxu0 %v2206_v44 }
  0x7f   :  { %775 = vmatpush.msra.mxu3 %v2233_v52  ;;  %756 = vmatpush.msra.mxu2 %v2265_v62 }
  0x80   :  { %737 = vmatpush.msra.mxu1 %v2244_v55  ;;  %718 = vmatpush.msrb.mxu0 %v2226_v50 }
  0x81   :  { %776 = vmatpush.msra.mxu3 %v2246_v56  ;;  %757 = vmatpush.msra.mxu2 %v2283_v3 }
  0x82   :  { %738 = vmatpush.msra.mxu1 %v2256_v59  ;;  %719 = vmatpush.msrb.mxu0 %v2238_v53 }
  0x83   :  { %777 = vmatpush.msra.mxu3 %v2258_v60  ;;  %758 = vmatpush.msra.mxu2 %v2295_v10 }
  0x84   :  { %739 = vmatpush.msra.mxu1 %v2274_v0  ;;  %720 = vmatpush.msrb.mxu0 %v2248_v57 }
  0x85   :  { %778 = vmatpush.msra.mxu3 %v2276_v1  ;;  %759 = vmatpush.msra.mxu2 %v2307_v16 }
  0x86   :  { %740 = vmatpush.msra.mxu1 %v2287_v4  ;;  %721 = vmatpush.msrb.mxu0 %v2269_v63 }
  0x87   :  { %779 = vmatpush.msra.mxu3 %v2289_v8  ;;  %760 = vmatpush.msra.mxu2 %v2321_v20 }
  0x88   :  { %741 = vmatpush.msra.mxu1 %v2299_v12  ;;  %722 = vmatpush.msrb.mxu0 %v2281_v2 }
  0x89   :  { %780 = vmatpush.msra.mxu3 %v2301_v13  ;;  %761 = vmatpush.msra.mxu2 %v2331_v35 }
  0x8a   :  { %742 = vmatpush.msra.mxu1 %v2314_v17  ;;  %723 = vmatpush.msrb.mxu0 %v3224_v6  ;;  %v95_v17 = vld [vmem:[%s3092_s3] sm:$0xf] }
  0x8b   :  { %781 = vmatpush.msra.mxu3 %v2317_v18  ;;  %762 = vmatpush.msra.mxu2 %v2341_v61  ;;  %v2523_v20 = vperm.slane %v95_v17, 2 }
  0x8c   :  { %743 = vmatpush.msra.mxu1 %v2325_v22  ;;  %724 = vmatpush.msrb.mxu0 %v3225_v7 }
  0x8d   :  { %782 = vmatpush.msra.mxu3 %v2327_v23  ;;  %763 = vmatpush.msra.mxu2 %v2346_v21  ;;  %v97_v23 = vperm.slane %v95_v17, 0 }
  0x8e   :  { %744 = vmatpush.msra.mxu1 %v2334_v48 }
  0x8f   :  { %783 = vmatpush.msra.mxu3 %v2336_v14  ;;  %764 = vmatpush.msra.mxu2 %v2357_v11  ;;  %v98_v11 = vperm.slane %v95_v17, 1 }
  0x91   :  { %784 = vmatpush.msra.mxu3 %v2350_v9 }
  0x95   :  { %v160_v6 = vpop.f32.mrf.mxu0  ;;  %v175_v61 = vpop.f32.mrf.mxu1 }
  0x96   :  { %v2507_v22 = vadd.f32 %v175_v61, %v97_v23 }
  0x98   :  { %3227 = vst [vmem:[#allocation13_spill] sm:$0xff] %v2507_v22 }
  0x9c   :  { %v178_v21 = vpop.f32.mrf.mxu2  ;;  %v181_v2 = vpop.f32.mrf.mxu3 }
  0x9d   :  { %v2509_v14 = vadd.f32 %v178_v21, %v97_v23  ;;  %v2511_v7 = vadd.f32 %v181_v2, %v97_v23  ;;  %v100_v21 = vperm.slane %v95_v17, 3 }
  0x9e   :  { %v163_v48 = vpop.f32.mrf.mxu0 }
  0x9f   :  { %3228 = vst [vmem:[#allocation40_spill] sm:$0xff] %v2509_v14  ;;  %v2513_v18 = vadd.f32 %v163_v48, %v97_v23  ;;  %v201_v35 = vpop.f32.mrf.mxu1 }
  0xa0   :  { %3229 = vst [vmem:[#allocation41_spill] sm:$0xff] %v2511_v7 }
  0xa1   :  { %3230 = vst [vmem:[#allocation42_spill] sm:$0xff] %v2513_v18 }
  0xa5   :  { %v2515_v12 = vpop.f32.mrf.mxu2 }
  0xa6   :  { %v2517_v63 = vpop.f32.mrf.mxu3  ;;  %v166_v9 = vpop.f32.mrf.mxu0 }
  0xa7   :  { %v2519_v13 = vadd.f32 %v166_v9, %v97_v23  ;;  %v204_v61 = vpop.f32.mrf.mxu1 }
  0xa8   :  { %v2521_v22 = vadd.f32 %v204_v61, %v98_v11 }
  0xa9   :  { %3231 = vst [vmem:[#allocation43_spill] sm:$0xff] %v2519_v13 }
  0xaa   :  { %3232 = vst [vmem:[#allocation44_spill] sm:$0xff] %v2521_v22 }
  0xad   :  { %v245_v2 = vpop.f32.mrf.mxu2 }
  0xae   :  { %v2526_v7 = vadd.f32 %v245_v2, %v2523_v20  ;;  %v286_v48 = vpop.f32.mrf.mxu3  ;;  %v169_v14 = vpop.f32.mrf.mxu0 }
  0xaf   :  { %v2528_v18 = vadd.f32 %v286_v48, %v100_v21  ;;  %v2530_v4 = vadd.f32 %v169_v14, %v97_v23  ;;  %v207_v57 = vpop.f32.mrf.mxu1 }
  0xb0   :  { %3233 = vst [vmem:[#allocation45_spill] sm:$0xff] %v2526_v7  ;;  %v2532_v8 = vadd.f32 %v207_v57, %v98_v11 }
  0xb1   :  { %3234 = vst [vmem:[#allocation46_spill] sm:$0xff] %v2528_v18 }
  0xb2   :  { %3235 = vst [vmem:[#allocation47_spill] sm:$0xff] %v2530_v4 }
  0xb3   :  { %3236 = vst [vmem:[#allocation48_spill] sm:$0xff] %v2532_v8 }
  0xb5   :  { %v248_v9 = vpop.f32.mrf.mxu2 }
  0xb6   :  { %v2535_v61 = vadd.f32 %v248_v9, %v2523_v20  ;;  %v289_v13 = vpop.f32.mrf.mxu3  ;;  %v172_v22 = vpop.f32.mrf.mxu0 }
  0xb7   :  { %v2537_v17 = vadd.f32 %v289_v13, %v100_v21  ;;  %v2539_v16 = vadd.f32 %v172_v22, %v97_v23  ;;  %v210_v2 = vpop.f32.mrf.mxu1 }
  0xb8   :  { %3237 = vst [vmem:[#allocation49_spill] sm:$0xff] %v2535_v61  ;;  %v2541_v7 = vadd.f32 %v210_v2, %v98_v11 }
  0xb9   :  { %3238 = vst [vmem:[#allocation50_spill] sm:$0xff] %v2537_v17  ;;  %v161_v17 = vadd.f32 %v160_v6, %v97_v23 }
  0xba   :  { %3239 = vst [vmem:[#allocation51_spill] sm:$0xff] %v2539_v16 }
  0xbb   :  { %3240 = vst [vmem:[#allocation52_spill] sm:$0xff] %v2541_v7 }
  0xbd   :  { %v251_v48 = vpop.f32.mrf.mxu2 }
  0xbe   :  { %v2544_v14 = vadd.f32 %v251_v48, %v2523_v20  ;;  %v292_v4 = vpop.f32.mrf.mxu3 }
  0xbf   :  { %v2546_v57 = vadd.f32 %v292_v4, %v100_v21  ;;  %v213_v8 = vpop.f32.mrf.mxu1 }
  0xc0   :  { %3241 = vst [vmem:[#allocation53_spill] sm:$0xff] %v2544_v14  ;;  %v2548_v18 = vadd.f32 %v213_v8, %v98_v11  ;;  %v424_v7 = vpop.f32.mrf.mxu0 }
  0xc1   :  { %3242 = vst [vmem:[#allocation54_spill] sm:$0xff] %v2546_v57  ;;  %v487_v48 = vadd.f32 %v424_v7, %v161_v17 }
  0xc2   :  { %3243 = vst [vmem:[#allocation55_spill] sm:$0xff] %v2548_v18 }
  0xc3   :  { %v1706_v0 = vmul.f32 -1.442695, %v487_v48 }
  0xc5   :  { %v254_v9 = vpop.f32.mrf.mxu2  ;;  %1752 = vpow2.f32 %v1706_v0 }
  0xc6   :  { %v2551_v61 = vadd.f32 %v254_v9, %v2523_v20  ;;  %v295_v13 = vpop.f32.mrf.mxu3 }
  0xc7   :  { %v2553_v22 = vadd.f32 %v295_v13, %v100_v21 }
  0xc8   :  { %3244 = vst [vmem:[#allocation56_spill] sm:$0xff] %v2551_v61  ;;  %v216_v16 = vpop.f32.mrf.mxu1 }
  0xc9   :  { %3245 = vst [vmem:[#allocation57_spill] sm:$0xff] %v2553_v22  ;;  %v2555_v2 = vadd.f32 %v216_v16, %v98_v11 }
  0xcb   :  { %3246 = vst [vmem:[#allocation58_spill] sm:$0xff] %v2555_v2  ;;  %v1753_v7 = vpop.eup %1752 }
  0xcc   :  { %v494_v17 = vadd.f32 1.0, %v1753_v7 }
  0xcd   :  { %v257_v14 = vpop.f32.mrf.mxu2 }
  0xce   :  { %v2558_v4 = vadd.f32 %v257_v14, %v2523_v20  ;;  %v298_v57 = vpop.f32.mrf.mxu3  ;;  %1754 = vrcp.f32 %v494_v17  ;;  %vm500_vm3 = vweird.f32 %v494_v17 }
  0xcf   :  { %v2560_v8 = vadd.f32 %v298_v57, %v100_v21  ;;  %v202_v57 = vadd.f32 %v201_v35, %v98_v11 }
  0xd0   :  { %3247 = vst [vmem:[#allocation59_spill] sm:$0xff] %v2558_v4  ;;  %v219_v18 = vpop.f32.mrf.mxu1 }
  0xd1   :  { %3248 = vst [vmem:[#allocation60_spill] sm:$0xff] %v2560_v8  ;;  %v2562_v9 = vadd.f32 %v219_v18, %v98_v11 }
  0xd3   :  { %3249 = vst [vmem:[#allocation61_spill] sm:$0xff] %v2562_v9 }
  0xd6   :  { %v260_v13 = vpop.f32.mrf.mxu2 }
  0xd7   :  { %v2565_v61 = vadd.f32 %v260_v13, %v2523_v20  ;;  %v301_v16 = vpop.f32.mrf.mxu3 }
  0xd8   :  { %v2567_v2 = vadd.f32 %v301_v16, %v100_v21  ;;  %v222_v23 = vpop.f32.mrf.mxu1  ;;  %v284_v16 = vadd.f32 %v2517_v63, %v100_v21 }
  0xd9   :  { %3250 = vst [vmem:[#allocation62_spill] sm:$0xff] %v2565_v61  ;;  %v2569_v6 = vadd.f32 %v222_v23, %v98_v11  ;;  %v1755_v23 = vpop.eup %1754 }
  0xda   :  { %3251 = vst [vmem:[#allocation63_spill] sm:$0xff] %v2567_v2  ;;  %v496_v8 = vmul.f32 %v1755_v23, %v494_v17  ;;  %vm501_vm2 = vweird.f32 %v1755_v23 }
  0xdb   :  { %3252 = vst [vmem:[#allocation64_spill] sm:$0xff] %v2569_v6  ;;  %vm502_vm5 = vmor %vm500_vm3, %vm501_vm2 }
  0xdc   :  { %v497_v35 = vsub.f32 1.0, %v496_v8  ;;  %v504_v8 = vand.u32 2147483647, %v494_v17 }
  0xde   :  { %v263_v14 = vpop.f32.mrf.mxu2  ;;  %vm505_vm8 = vcmp.eq.f32.partialorder %v504_v8, 8.507059e+37 }
  0xdf   :  { %v2572_v4 = vadd.f32 %v263_v14, %v2523_v20  ;;  %v304_v18 = vpop.f32.mrf.mxu3 }
  0xe0   :  { %v2574_v48 = vadd.f32 %v304_v18, %v100_v21  ;;  %v444_v0 = vpop.f32.mrf.mxu1  ;;  %v243_v18 = vadd.f32 %v2515_v12, %v2523_v20 }
  0xe1   :  { %3253 = vst [vmem:[#allocation65_spill] sm:$0xff] %v2572_v4  ;;  %v488_v9 = vadd.f32 %v444_v0, %v202_v57 }
  0xe2   :  { %3254 = vst [vmem:[#allocation66_spill] sm:$0xff] %v2574_v48 }
  0xe3   :  { %v1707_v13 = vmul.f32 -1.442695, %v488_v9  ;;  %v498_v9 = vmul.f32 %v1755_v23, %v497_v35 }
  0xe5   :  { %1756 = vpow2.f32 %v1707_v13 }
  0xe6   :  { %v464_v14 = vpop.f32.mrf.mxu2 }
  0xe7   :  { %v484_v61 = vpop.f32.mrf.mxu3  ;;  %v489_v0 = vadd.f32 %v464_v14, %v243_v18 }
  0xe8   :  { %v490_v6 = vadd.f32 %v484_v61, %v284_v16  ;;  %v499_v61 = vadd.f32 %v1755_v23, %v498_v9 }
  0xea   :  { %v1708_v2 = vmul.f32 -1.442695, %v490_v6  ;;  %v503_v20 = vsel %vm502_vm5, %v1755_v23, %v499_v61 }
  0xeb   :  { %v1757_v7 = vpop.eup %1756 }
  0xec   :  { %v513_v11 = vadd.f32 1.0, %v1757_v7  ;;  %1758 = vpow2.f32 %v1708_v2  ;;  %v506_v2 = vand.u32 2147483648, %v494_v17 }
  0xee   :  { %1760 = vrcp.f32 %v513_v11  ;;  %v525_v6 = vand.u32 2147483648, %v513_v11  ;;  %v523_v7 = vand.u32 2147483647, %v513_v11  ;;  %vm519_vm6 = vweird.f32 %v513_v11 }
  0xf0   :  { %v526_v18 = vor.u32 1.1754944e-38, %v525_v6  ;;  %vm524_vm9 = vcmp.eq.f32.partialorder %v523_v7, 8.507059e+37 }
  0xf2   :  { %v1759_v57 = vpop.eup %1758 }
  0xf3   :  { %v533_v13 = vadd.f32 1.0, %v1759_v57  ;;  %v507_v57 = vor.u32 1.1754944e-38, %v506_v2 }
  0xf4   :  { %v1761_v4 = vpop.eup %1760 }
  0xf5   :  { %v515_v63 = vmul.f32 %v1761_v4, %v513_v11  ;;  %1762 = vrcp.f32 %v533_v13  ;;  %vm520_vm4 = vweird.f32 %v1761_v4  ;;  %v545_v23 = vand.u32 2147483648, %v533_v13 }
  0xf6   :  { %1764 = vtanh.f32 %v489_v0  ;;  %vm521_vm7 = vmor %vm519_vm6, %vm520_vm4  ;;  %vm539_vm11 = vweird.f32 %v533_v13  ;;  %v543_v11 = vand.u32 2147483647, %v533_v13 }
  0xf7   :  { %v516_v21 = vsub.f32 1.0, %v515_v63  ;;  %v508_v63 = vsel %vm505_vm8, %v507_v57, %v503_v20  ;;  %v546_v6 = vor.u32 1.1754944e-38, %v545_v23  ;;  %v3284_v20 = vld [vmem:[#allocation45_spill] sm:$0xff] }
  0xf8   :  { %vm544_vm13 = vcmp.eq.f32.partialorder %v543_v11, 8.507059e+37 }
  0xf9   :  { %v517_v16 = vmul.f32 %v1761_v4, %v516_v21 }
  0xfb   :  { %v1763_v12 = vpop.eup %1762  ;;  %v518_v35 = vadd.f32 %v1761_v4, %v517_v16 }
  0xfc   :  { %v1765_v14 = vpop.eup %1764  ;;  %v535_v0 = vmul.f32 %v1763_v12, %v533_v13  ;;  %vm540_vm10 = vweird.f32 %v1763_v12 }
  0xfd   :  { %v522_v9 = vsel %vm521_vm7, %v1761_v4, %v518_v35  ;;  %v550_v17 = vmul.f32 %v1765_v14, %v508_v63  ;;  %vm541_vm12 = vmor %vm539_vm11, %vm540_vm10 }
  0xfe   :  { %v527_v48 = vsel %vm524_vm9, %v526_v18, %v522_v9  ;;  %v536_v22 = vsub.f32 1.0, %v535_v0 }
  0xff   :  { %v549_v21 = vmul.f32 0.0, %v527_v48 }
 0x100   :  { %v537_v53 = vmul.f32 %v1763_v12, %v536_v22 }
 0x101   :  { %v2579_v1 = vadd.f32 %v550_v17, %v549_v21 }
 0x102   :  { %v538_v10 = vadd.f32 %v1763_v12, %v537_v53 }
 0x103   :  { %1766 = vtanh.f32 %v2579_v1 }
 0x104   :  { %v542_v61 = vsel %vm541_vm12, %v1763_v12, %v538_v10 }
 0x105   :  { %v547_v2 = vsel %vm544_vm13, %v546_v6, %v542_v61 }
 0x109   :  { %v1767_v4 = vpop.eup %1766 }
 0x10a   :  { %v553_v16 = vmul.f32 %v1767_v4, %v547_v2 }
 0x10c   :  { %574 = vmatmul.f32.vlgmr.msra.gmra.mxu0 %v553_v16  ;;  %594 = vmatmul.f32.vlgmr.msrb.gmra.mxu1 %v553_v16 }
 0x10d   :  { %614 = vmatmul.f32.vlgmr.msrb.gmra.mxu2 %v553_v16  ;;  %634 = vmatmul.f32.vlgmr.msrb.gmra.mxu3 %v553_v16 }
 0x10e   :  { %860 = vmatpush.msra.mxu0 %v3226_v5  ;;  %880 = vmatpush.msrb.mxu1 %v2143_v24  ;;  %v3257_v24 = vld [vmem:[#allocation14_spill] sm:$0xff] }
 0x10f   :  { %900 = vmatpush.msrb.mxu2 %v2154_v28  ;;  %920 = vmatpush.msrb.mxu3 %v2146_v25  ;;  %v3258_v25 = vld [vmem:[#allocation17_spill] sm:$0xff]  ;;  %v3261_v28 = vld [vmem:[#allocation15_spill] sm:$0xff] }
 0x110   :  { %861 = vmatpush.msra.mxu0 %v2132_v15  ;;  %881 = vmatpush.msrb.mxu1 %v2152_v27  ;;  %v3255_v15 = vld [vmem:[#allocation23_spill] sm:$0xff]  ;;  %v3260_v27 = vld [vmem:[#allocation21_spill] sm:$0xff] }
 0x111   :  { %901 = vmatpush.msrb.mxu2 %v2166_v32  ;;  %921 = vmatpush.msrb.mxu3 %v2160_v30  ;;  %v3263_v30 = vld [vmem:[#allocation30_spill] sm:$0xff]  ;;  %v3265_v32 = vld [vmem:[#allocation16_spill] sm:$0xff] }
 0x112   :  { %862 = vmatpush.msra.mxu0 %v2136_v19  ;;  %882 = vmatpush.msrb.mxu1 %v2164_v31  ;;  %v3256_v19 = vld [vmem:[#allocation18_spill] sm:$0xff]  ;;  %v3264_v31 = vld [vmem:[#allocation25_spill] sm:$0xff] }
 0x113   :  { %902 = vmatpush.msrb.mxu2 %v2197_v41  ;;  %922 = vmatpush.msrb.mxu3 %v2171_v34  ;;  %v3267_v34 = vld [vmem:[#allocation33_spill] sm:$0xff]  ;;  %v3273_v41 = vld [vmem:[#allocation22_spill] sm:$0xff] }
 0x114   :  { %863 = vmatpush.msra.mxu0 %v2148_v26  ;;  %883 = vmatpush.msrb.mxu1 %v2179_v36  ;;  %v3259_v26 = vld [vmem:[#allocation27_spill] sm:$0xff]  ;;  %v3268_v36 = vld [vmem:[#allocation29_spill] sm:$0xff] }
 0x115   :  { %903 = vmatpush.msrb.mxu2 %v2209_v45  ;;  %923 = vmatpush.msrb.mxu3 %v2191_v39  ;;  %v3271_v39 = vld [vmem:[#allocation36_spill] sm:$0xff]  ;;  %v3277_v45 = vld [vmem:[#allocation26_spill] sm:$0xff] }
 0x116   :  { %864 = vmatpush.msra.mxu0 %v2158_v29  ;;  %884 = vmatpush.msrb.mxu1 %v2189_v38  ;;  %v3262_v29 = vld [vmem:[#allocation20_spill] sm:$0xff] }
 0x117   :  { %904 = vmatpush.msrb.mxu2 %v2222_v49  ;;  %924 = vmatpush.msrb.mxu3 %v2203_v43  ;;  %v3270_v38 = vld [vmem:[#allocation28_spill] sm:$0xff]  ;;  %v3275_v43 = vld [vmem:[#allocation37_spill] sm:$0xff]  ;;  %v3280_v49 = vld [vmem:[#allocation38_spill] sm:$0xff] }
 0x118   :  { %865 = vmatpush.msra.mxu0 %v2169_v33  ;;  %885 = vmatpush.msrb.mxu1 %v2201_v42  ;;  %v3266_v33 = vld [vmem:[#allocation24_spill] sm:$0xff]  ;;  %v3274_v42 = vld [vmem:[#allocation31_spill] sm:$0xff] }
 0x119   :  { %905 = vmatpush.msrb.mxu2 %v2240_v54  ;;  %925 = vmatpush.msrb.mxu3 %v2215_v47  ;;  %v3279_v47 = vld [vmem:[#allocation39_spill] sm:$0xff]  ;;  %v3282_v54 = vld [vmem:[#allocation44_spill] sm:$0xff] }
 0x11a   :  { %866 = vmatpush.msra.mxu0 %v2184_v37  ;;  %886 = vmatpush.msrb.mxu1 %v2213_v46  ;;  %v3269_v37 = vld [vmem:[#allocation19_spill] sm:$0xff]  ;;  %v3278_v46 = vld [vmem:[#allocation34_spill] sm:$0xff] }
 0x11b   :  { %906 = vmatpush.msrb.mxu2 %v2252_v58  ;;  %926 = vmatpush.msrb.mxu3 %v2233_v52  ;;  %v3281_v52 = vld [vmem:[#allocation42_spill] sm:$0xff] }
 0x11c   :  { %867 = vmatpush.msra.mxu0 %v2195_v40  ;;  %887 = vmatpush.msrb.mxu1 %v2231_v51  ;;  %v3272_v40 = vld [vmem:[#allocation32_spill] sm:$0xff] }
 0x11d   :  { %907 = vmatpush.msrb.mxu2 %v2265_v62  ;;  %927 = vmatpush.msrb.mxu3 %v2246_v56 }
 0x11e   :  { %868 = vmatpush.msra.mxu0 %v2206_v44  ;;  %888 = vmatpush.msrb.mxu1 %v2244_v55  ;;  %v3276_v44 = vld [vmem:[#allocation35_spill] sm:$0xff] }
 0x11f   :  { %908 = vmatpush.msrb.mxu2 %v2283_v3  ;;  %928 = vmatpush.msrb.mxu3 %v2258_v60  ;;  %v3283_v60 = vld [vmem:[#allocation46_spill] sm:$0xff] }
 0x120   :  { %869 = vmatpush.msra.mxu0 %v2226_v50  ;;  %889 = vmatpush.msrb.mxu1 %v2256_v59 }
 0x121   :  { %909 = vmatpush.msrb.mxu2 %v3255_v15  ;;  %929 = vmatpush.msrb.mxu3 %v3256_v19 }
 0x122   :  { %870 = vmatpush.msra.mxu0 %v3257_v24  ;;  %890 = vmatpush.msrb.mxu1 %v3258_v25 }
 0x123   :  { %910 = vmatpush.msrb.mxu2 %v3259_v26  ;;  %930 = vmatpush.msrb.mxu3 %v3260_v27 }
 0x124   :  { %871 = vmatpush.msra.mxu0 %v3261_v28  ;;  %891 = vmatpush.msrb.mxu1 %v3262_v29 }
 0x125   :  { %911 = vmatpush.msrb.mxu2 %v3263_v30  ;;  %931 = vmatpush.msrb.mxu3 %v3264_v31 }
 0x126   :  { %872 = vmatpush.msra.mxu0 %v3265_v32  ;;  %892 = vmatpush.msrb.mxu1 %v3266_v33 }
 0x127   :  { %912 = vmatpush.msrb.mxu2 %v3267_v34  ;;  %932 = vmatpush.msrb.mxu3 %v3268_v36 }
 0x128   :  { %873 = vmatpush.msra.mxu0 %v3269_v37  ;;  %893 = vmatpush.msrb.mxu1 %v3270_v38 }
 0x129   :  { %913 = vmatpush.msrb.mxu2 %v3271_v39  ;;  %933 = vmatpush.msrb.mxu3 %v3272_v40 }
 0x12a   :  { %874 = vmatpush.msra.mxu0 %v3273_v41  ;;  %894 = vmatpush.msrb.mxu1 %v3274_v42 }
 0x12b   :  { %914 = vmatpush.msrb.mxu2 %v3275_v43  ;;  %934 = vmatpush.msrb.mxu3 %v3276_v44 }
 0x12c   :  { %875 = vmatpush.msra.mxu0 %v3277_v45  ;;  %895 = vmatpush.msrb.mxu1 %v3278_v46 }
 0x12d   :  { %915 = vmatpush.msrb.mxu2 %v3279_v47  ;;  %935 = vmatpush.msrb.mxu3 %v3280_v49 }
 0x189   :  { %v575_v50 = vpop.f32.mrf.mxu0  ;;  %v595_v51 = vpop.f32.mrf.mxu1 }
 0x18a   :  { %v638_v53 = vadd.f32 %v575_v50, %v3281_v52  ;;  %v639_v55 = vadd.f32 %v595_v51, %v3282_v54 }
 0x18c   :  { %v1709_v56 = vmul.f32 -1.442695, %v638_v53  ;;  %v1710_v58 = vmul.f32 -1.442695, %v639_v55 }
 0x18e   :  { %1768 = vpow2.f32 %v1709_v56 }
 0x18f   :  { %1770 = vpow2.f32 %v1710_v58 }
 0x190   :  { %v635_v59 = vpop.f32.mrf.mxu3  ;;  %v615_v13 = vpop.f32.mrf.mxu2 }
 0x191   :  { %v641_v62 = vadd.f32 %v635_v59, %v3283_v60  ;;  %v640_v35 = vadd.f32 %v615_v13, %v3284_v20  ;;  %v2657_v59 = vld [vmem:[#allocation6 + $0x1e8] sm:$0xff]  ;;  %v2660_v60 = vld [vmem:[#allocation6 + $0x1f0] sm:$0xff] }
 0x192   :  { %v2681_v13 = vld [vmem:[#allocation6 + $0x1a8] sm:$0xff] }
 0x193   :  { %v1711_v3 = vmul.f32 -1.442695, %v641_v62  ;;  %v2663_v62 = vld [vmem:[#allocation6 + $0x1f8] sm:$0xff]  ;;  %v2693_v20 = vld [vmem:[#allocation6 + $0x188] sm:$0xff] }
 0x194   :  { %v1769_v10 = vpop.eup %1768 }
 0x195   :  { %v1771_v5 = vpop.eup %1770  ;;  %v645_v22 = vadd.f32 1.0, %v1769_v10  ;;  %1772 = vpow2.f32 %v1711_v3  ;;  %v2666_v3 = vld [vmem:[#allocation6 + $0x1c0] sm:$0xff]  ;;  %v2669_v10 = vld [vmem:[#allocation6 + $0x1c8] sm:$0xff] }
 0x196   :  { %v664_v48 = vadd.f32 1.0, %v1771_v5  ;;  %v2672_v5 = vld [vmem:[#allocation6 + $0x1d0] sm:$0xff] }
 0x197   :  { %1774 = vrcp.f32 %v645_v22  ;;  %v657_v63 = vand.u32 2147483648, %v645_v22  ;;  %v655_v23 = vand.u32 2147483647, %v645_v22  ;;  %vm651_vm0 = vweird.f32 %v645_v22 }
 0x198   :  { %1776 = vrcp.f32 %v664_v48  ;;  %v676_v21 = vand.u32 2147483648, %v664_v48  ;;  %v674_v61 = vand.u32 2147483647, %v664_v48  ;;  %vm670_vm1 = vweird.f32 %v664_v48 }
 0x199   :  { %v658_v2 = vor.u32 1.1754944e-38, %v657_v63  ;;  %vm656_vm4 = vcmp.eq.f32.partialorder %v655_v23, 8.507059e+37  ;;  %v2714_v63 = vld [vmem:[#allocation6 + $0x140] sm:$0xff]  ;;  %v2723_v23 = vld [vmem:[#allocation6 + $0x158] sm:$0xff] }
 0x19a   :  { %v677_v24 = vor.u32 1.1754944e-38, %v676_v21  ;;  %vm675_vm5 = vcmp.eq.f32.partialorder %v674_v61, 8.507059e+37  ;;  %v2717_v21 = vld [vmem:[#allocation6 + $0x148] sm:$0xff] }
 0x19b   :  { %v1773_v8 = vpop.eup %1772  ;;  %v2729_v61 = vld [vmem:[#allocation6 + $0x128] sm:$0xff] }
 0x19c   :  { %v684_v7 = vadd.f32 1.0, %v1773_v8  ;;  %v2684_v8 = vld [vmem:[#allocation6 + $0x1b0] sm:$0xff] }
 0x19d   :  { %v1775_v12 = vpop.eup %1774 }
 0x19e   :  { %v1777_v14 = vpop.eup %1776  ;;  %v647_v18 = vmul.f32 %v1775_v12, %v645_v22  ;;  %1778 = vrcp.f32 %v684_v7  ;;  %vm652_vm14 = vweird.f32 %v1775_v12  ;;  %v696_v51 = vand.u32 2147483648, %v684_v7  ;;  %v2675_v22 = vld [vmem:[#allocation6 + $0x1d8] sm:$0xff] }
 0x19f   :  { %v666_v57 = vmul.f32 %v1777_v14, %v664_v48  ;;  %1780 = vtanh.f32 %v640_v35  ;;  %vm671_vm15 = vweird.f32 %v1777_v14  ;;  %vm653_vm2 = vmor %vm651_vm0, %vm652_vm14  ;;  %vm690_vm7 = vweird.f32 %v684_v7  ;;  %v2678_v48 = vld [vmem:[#allocation6 + $0x1a0] sm:$0xff]  ;;  %v2696_v35 = vld [vmem:[#allocation6 + $0x190] sm:$0xff] }
 0x1a0   :  { %v648_v0 = vsub.f32 1.0, %v647_v18  ;;  %vm672_vm3 = vmor %vm670_vm1, %vm671_vm15  ;;  %v694_v52 = vand.u32 2147483647, %v684_v7  ;;  %v697_v54 = vor.u32 1.1754944e-38, %v696_v51  ;;  %v2702_v18 = vld [vmem:[#allocation6 + $0x160] sm:$0xff] }
 0x1a1   :  { %v667_v9 = vsub.f32 1.0, %v666_v57  ;;  %v2705_v57 = vld [vmem:[#allocation6 + $0x168] sm:$0xff]  ;;  %v2782_v51 = vld [vmem:[#allocation6 + $0x80] sm:$0xff] }
 0x1a2   :  { %v649_v17 = vmul.f32 %v1775_v12, %v648_v0  ;;  %vm695_vm9 = vcmp.eq.f32.partialorder %v694_v52, 8.507059e+37  ;;  %v2708_v0 = vld [vmem:[#allocation6 + $0x170] sm:$0xff]  ;;  %3289 = vst [vmem:[#allocation27_spill] sm:$0xff] %v2782_v51  ;;  %v2789_v52 = vld [vmem:[#allocation6 + $0x98] sm:$0xff] }
 0x1a3   :  { %v668_v11 = vmul.f32 %v1777_v14, %v667_v9  ;;  %v2711_v9 = vld [vmem:[#allocation6 + $0x178] sm:$0xff]  ;;  %3291 = vst [vmem:[#allocation15_spill] sm:$0xff] %v2789_v52 }
 0x1a4   :  { %v1779_v6 = vpop.eup %1778  ;;  %v650_v4 = vadd.f32 %v1775_v12, %v649_v17  ;;  %v2720_v17 = vld [vmem:[#allocation6 + $0x150] sm:$0xff] }
 0x1a5   :  { %v669_v16 = vadd.f32 %v1777_v14, %v668_v11  ;;  %v686_v19 = vmul.f32 %v1779_v6, %v684_v7  ;;  %v1781_v27 = vpop.eup %1780  ;;  %vm691_vm6 = vweird.f32 %v1779_v6  ;;  %v2687_v7 = vld [vmem:[#allocation6 + $0x1b8] sm:$0xff]  ;;  %v2726_v11 = vld [vmem:[#allocation6 + $0x120] sm:$0xff] }
 0x1a6   :  { %v654_v25 = vsel %vm653_vm2, %v1775_v12, %v650_v4  ;;  %vm692_vm8 = vmor %vm690_vm7, %vm691_vm6  ;;  %v2690_v12 = vld [vmem:[#allocation6 + $0x180] sm:$0xff]  ;;  %v2735_v4 = vld [vmem:[#allocation6 + $0x138] sm:$0xff] }
 0x1a7   :  { %v659_v28 = vsel %vm656_vm4, %v658_v2, %v654_v25  ;;  %v673_v29 = vsel %vm672_vm3, %v1777_v14, %v669_v16  ;;  %v687_v31 = vsub.f32 1.0, %v686_v19  ;;  %v2699_v14 = vld [vmem:[#allocation6 + $0x198] sm:$0xff]  ;;  %v2738_v2 = vld [vmem:[#allocation6 + $0x100] sm:$0xff]  ;;  %v2741_v16 = vld [vmem:[#allocation6 + $0x108] sm:$0xff] }
 0x1a8   :  { %v678_v32 = vsel %vm675_vm5, %v677_v24, %v673_v29  ;;  %v701_v33 = vmul.f32 %v1781_v27, %v659_v28  ;;  %v2744_v19 = vld [vmem:[#allocation6 + $0x110] sm:$0xff]  ;;  %v2747_v24 = vld [vmem:[#allocation6 + $0x118] sm:$0xff]  ;;  %v2750_v25 = vld [vmem:[#allocation6 + $0xe0] sm:$0xff] }
 0x1a9   :  { %v700_v37 = vmul.f32 %v678_v32, %v2579_v1  ;;  %v688_v41 = vmul.f32 %v1779_v6, %v687_v31  ;;  %v2654_v1 = vld [vmem:[#allocation6 + $0x1e0] sm:$0xff]  ;;  %v2753_v27 = vld [vmem:[#allocation6 + $0xe8] sm:$0xff]  ;;  %v2756_v28 = vld [vmem:[#allocation6 + $0xf0] sm:$0xff] }
 0x1aa   :  { %v2759_v29 = vld [vmem:[#allocation6 + $0xf8] sm:$0xff]  ;;  %v2762_v31 = vld [vmem:[#allocation6 + $0xc0] sm:$0xff]  ;;  %v2765_v32 = vld [vmem:[#allocation6 + $0xc8] sm:$0xff] }
 0x1ab   :  { %v2651_v45 = vadd.f32 %v701_v33, %v700_v37  ;;  %v689_v50 = vadd.f32 %v1779_v6, %v688_v41  ;;  %v2769_v33 = vld [vmem:[#allocation6 + $0xd8] sm:$0xff]  ;;  %v2772_v37 = vld [vmem:[#allocation6 + $0xa0] sm:$0xff]  ;;  %v2775_v41 = vld [vmem:[#allocation6 + $0xa8] sm:$0xff] }
 0x1ac   :  { %3285 = vst [vmem:[#allocation23_spill] sm:$0xff] %v2769_v33 }
 0x1ad   :  { %1782 = vtanh.f32 %v2651_v45  ;;  %v693_v53 = vsel %vm692_vm8, %v1779_v6, %v689_v50  ;;  %v2732_v6 = vld [vmem:[#allocation6 + $0x130] sm:$0xff]  ;;  %3286 = vst [vmem:[#allocation18_spill] sm:$0xff] %v2772_v37  ;;  %v2779_v50 = vld [vmem:[#allocation6 + $0xb8] sm:$0xff] }
 0x1ae   :  { %v698_v56 = vsel %vm695_vm9, %v697_v54, %v693_v53  ;;  %3287 = vst [vmem:[#allocation14_spill] sm:$0xff] %v2775_v41  ;;  %v2792_v53 = vld [vmem:[#allocation6 + $0x60] sm:$0xff] }
 0x1af   :  { %3288 = vst [vmem:[#allocation17_spill] sm:$0xff] %v2779_v50  ;;  %v2800_v54 = vld [vmem:[#allocation6 + $0x40] sm:$0xff] }
 0x1b0   :  { %3292 = vst [vmem:[#allocation20_spill] sm:$0xff] %v2792_v53 }
 0x1b1   :  { %3294 = vst [vmem:[#allocation25_spill] sm:$0xff] %v2800_v54 }
 0x1b3   :  { %v1783_v55 = vpop.eup %1782 }
 0x1b4   :  { %v704_v58 = vmul.f32 %v1783_v55, %v698_v56  ;;  %v3298_v55 = vld [vmem:[#allocation48_spill] sm:$0xff] }
 0x1b6   :  { %725 = vmatmul.f32.vlgmr.msrb.gmra.mxu0 %v704_v58  ;;  %745 = vmatmul.f32.vlgmr.msra.gmra.mxu1 %v704_v58 }
 0x1b7   :  { %765 = vmatmul.f32.vlgmr.msra.gmra.mxu2 %v704_v58  ;;  %785 = vmatmul.f32.vlgmr.msra.gmra.mxu3 %v704_v58  ;;  %v3299_v58 = vld [vmem:[#allocation50_spill] sm:$0xff] }
 0x1b8   :  { %1011 = vmatpush.msrb.mxu0 %v2654_v1  ;;  %1031 = vmatpush.msra.mxu1 %v2657_v59 }
 0x1b9   :  { %1051 = vmatpush.msra.mxu2 %v2660_v60  ;;  %1071 = vmatpush.msra.mxu3 %v2663_v62 }
 0x1ba   :  { %1012 = vmatpush.msrb.mxu0 %v2666_v3  ;;  %1032 = vmatpush.msra.mxu1 %v2669_v10 }
 0x1bb   :  { %1052 = vmatpush.msra.mxu2 %v2672_v5  ;;  %1072 = vmatpush.msra.mxu3 %v2675_v22 }
 0x1bc   :  { %1013 = vmatpush.msrb.mxu0 %v2678_v48  ;;  %1033 = vmatpush.msra.mxu1 %v2681_v13 }
 0x1bd   :  { %1053 = vmatpush.msra.mxu2 %v2684_v8  ;;  %1073 = vmatpush.msra.mxu3 %v2687_v7 }
 0x1be   :  { %1014 = vmatpush.msrb.mxu0 %v2690_v12  ;;  %1034 = vmatpush.msra.mxu1 %v2693_v20 }
 0x1bf   :  { %1054 = vmatpush.msra.mxu2 %v2696_v35  ;;  %1074 = vmatpush.msra.mxu3 %v2699_v14 }
 0x1c0   :  { %1015 = vmatpush.msrb.mxu0 %v2702_v18  ;;  %1035 = vmatpush.msra.mxu1 %v2705_v57 }
 0x1c1   :  { %1055 = vmatpush.msra.mxu2 %v2708_v0  ;;  %1075 = vmatpush.msra.mxu3 %v2711_v9 }
 0x1c2   :  { %1016 = vmatpush.msrb.mxu0 %v2714_v63  ;;  %1036 = vmatpush.msra.mxu1 %v2717_v21 }
 0x1c3   :  { %1056 = vmatpush.msra.mxu2 %v2720_v17  ;;  %1076 = vmatpush.msra.mxu3 %v2723_v23 }
 0x1c4   :  { %1017 = vmatpush.msrb.mxu0 %v2726_v11  ;;  %1037 = vmatpush.msra.mxu1 %v2729_v61 }
 0x1c5   :  { %1057 = vmatpush.msra.mxu2 %v2732_v6  ;;  %1077 = vmatpush.msra.mxu3 %v2735_v4 }
 0x1c6   :  { %1018 = vmatpush.msrb.mxu0 %v2738_v2  ;;  %1038 = vmatpush.msra.mxu1 %v2741_v16 }
 0x1c7   :  { %1058 = vmatpush.msra.mxu2 %v2744_v19  ;;  %1078 = vmatpush.msra.mxu3 %v2747_v24 }
 0x1c8   :  { %1019 = vmatpush.msrb.mxu0 %v2750_v25  ;;  %1039 = vmatpush.msra.mxu1 %v2753_v27 }
 0x1c9   :  { %1059 = vmatpush.msra.mxu2 %v2756_v28  ;;  %1079 = vmatpush.msra.mxu3 %v2759_v29 }
 0x1ca   :  { %1020 = vmatpush.msrb.mxu0 %v2762_v31  ;;  %1040 = vmatpush.msra.mxu1 %v2765_v32 }
 0x1cb   :  { %1060 = vmatpush.msra.mxu2 %v3255_v15  ;;  %1080 = vmatpush.msra.mxu3 %v2769_v33  ;;  %v2785_v15 = vld [vmem:[#allocation6 + $0x88] sm:$0xff] }
 0x1cc   :  { %1021 = vmatpush.msrb.mxu0 %v2772_v37  ;;  %1041 = vmatpush.msra.mxu1 %v2775_v41  ;;  %3290 = vst [vmem:[#allocation21_spill] sm:$0xff] %v2785_v15 }
 0x1cd   :  { %1061 = vmatpush.msra.mxu2 %v3259_v26  ;;  %1081 = vmatpush.msra.mxu3 %v2779_v50  ;;  %v2795_v26 = vld [vmem:[#allocation6 + $0x68] sm:$0xff] }
 0x1ce   :  { %1022 = vmatpush.msrb.mxu0 %v2782_v51  ;;  %1042 = vmatpush.msra.mxu1 %v2785_v15  ;;  %3293 = vst [vmem:[#allocation30_spill] sm:$0xff] %v2795_v26 }
 0x1cf   :  { %1062 = vmatpush.msra.mxu2 %v3263_v30  ;;  %1082 = vmatpush.msra.mxu3 %v2789_v52  ;;  %v2806_v30 = vld [vmem:[#allocation6 + $0x20] sm:$0xff] }
 0x1d0   :  { %1023 = vmatpush.msrb.mxu0 %v2792_v53  ;;  %1043 = vmatpush.msra.mxu1 %v2795_v26  ;;  %3295 = vst [vmem:[#allocation16_spill] sm:$0xff] %v2806_v30 }
 0x1d1   :  { %1063 = vmatpush.msra.mxu2 %v3267_v34  ;;  %1083 = vmatpush.msra.mxu3 %v3268_v36  ;;  %v2812_v34 = vld [vmem:[#allocation6] sm:$0xff] }
 0x1d2   :  { %1024 = vmatpush.msrb.mxu0 %v2800_v54  ;;  %1044 = vmatpush.msra.mxu1 %v3270_v38  ;;  %3296 = vst [vmem:[#allocation24_spill] sm:$0xff] %v2812_v34 }
 0x1d3   :  { %1064 = vmatpush.msra.mxu2 %v3271_v39  ;;  %1084 = vmatpush.msra.mxu3 %v3272_v40  ;;  %v3297_v39 = vld [vmem:[#allocation43_spill] sm:$0xff] }
 0x1d4   :  { %1025 = vmatpush.msrb.mxu0 %v2806_v30  ;;  %1045 = vmatpush.msra.mxu1 %v3274_v42 }
 0x1d5   :  { %1065 = vmatpush.msra.mxu2 %v3275_v43  ;;  %1085 = vmatpush.msra.mxu3 %v3276_v44 }
 0x1d6   :  { %1026 = vmatpush.msrb.mxu0 %v2812_v34  ;;  %1046 = vmatpush.msra.mxu1 %v3278_v46 }
 0x1d7   :  { %1066 = vmatpush.msra.mxu2 %v3279_v47  ;;  %1086 = vmatpush.msra.mxu3 %v3280_v49 }
 0x233   :  { %v726_v36 = vpop.f32.mrf.mxu0  ;;  %v746_v38 = vpop.f32.mrf.mxu1 }
 0x234   :  { %v789_v40 = vadd.f32 %v726_v36, %v3297_v39  ;;  %v790_v42 = vadd.f32 %v746_v38, %v3298_v55  ;;  %v3300_v38 = vld [vmem:[#allocation49_spill] sm:$0xff] }
 0x236   :  { %v1712_v56 = vmul.f32 -1.442695, %v789_v40  ;;  %v1713_v43 = vmul.f32 -1.442695, %v790_v42 }
 0x238   :  { %1784 = vpow2.f32 %v1712_v56 }
 0x239   :  { %1786 = vpow2.f32 %v1713_v43 }
 0x23a   :  { %v786_v44 = vpop.f32.mrf.mxu3  ;;  %v766_v49 = vpop.f32.mrf.mxu2 }
 0x23b   :  { %v792_v30 = vadd.f32 %v786_v44, %v3299_v58  ;;  %v791_v40 = vadd.f32 %v766_v49, %v3300_v38 }
 0x23d   :  { %v1714_v34 = vmul.f32 -1.442695, %v792_v30 }
 0x23e   :  { %v1785_v54 = vpop.eup %1784 }
 0x23f   :  { %v1787_v46 = vpop.eup %1786  ;;  %v796_v26 = vadd.f32 1.0, %v1785_v54  ;;  %1788 = vpow2.f32 %v1714_v34 }
 0x240   :  { %v815_v47 = vadd.f32 1.0, %v1787_v46 }
 0x241   :  { %1790 = vrcp.f32 %v796_v26  ;;  %v808_v30 = vand.u32 2147483648, %v796_v26  ;;  %v806_v34 = vand.u32 2147483647, %v796_v26  ;;  %vm802_vm12 = vweird.f32 %v796_v26 }
 0x242   :  { %1792 = vrcp.f32 %v815_v47  ;;  %v827_v58 = vand.u32 2147483648, %v815_v47  ;;  %v825_v52 = vand.u32 2147483647, %v815_v47  ;;  %vm821_vm13 = vweird.f32 %v815_v47 }
 0x243   :  { %v809_v49 = vor.u32 1.1754944e-38, %v808_v30  ;;  %vm807_vm0 = vcmp.eq.f32.partialorder %v806_v34, 8.507059e+37 }
 0x244   :  { %vm826_vm1 = vcmp.eq.f32.partialorder %v825_v52, 8.507059e+37 }
 0x245   :  { %v1789_v53 = vpop.eup %1788 }
 0x246   :  { %v835_v36 = vadd.f32 1.0, %v1789_v53 }
 0x247   :  { %v1791_v39 = vpop.eup %1790 }
 0x248   :  { %v1793_v55 = vpop.eup %1792  ;;  %v798_v42 = vmul.f32 %v1791_v39, %v796_v26  ;;  %1794 = vrcp.f32 %v835_v36  ;;  %vm803_vm10 = vweird.f32 %v1791_v39  ;;  %v847_v30 = vand.u32 2147483648, %v835_v36 }
 0x249   :  { %v817_v56 = vmul.f32 %v1793_v55, %v815_v47  ;;  %1796 = vtanh.f32 %v791_v40  ;;  %vm822_vm11 = vweird.f32 %v1793_v55  ;;  %vm804_vm14 = vmor %vm802_vm12, %vm803_vm10  ;;  %vm841_vm3 = vweird.f32 %v835_v36 }
 0x24a   :  { %v799_v43 = vsub.f32 1.0, %v798_v42  ;;  %vm823_vm15 = vmor %vm821_vm13, %vm822_vm11  ;;  %v828_v42 = vor.u32 1.1754944e-38, %v827_v58  ;;  %v848_v34 = vor.u32 1.1754944e-38, %v847_v30  ;;  %v3319_v30 = vld [vmem:[#allocation16_spill] sm:$0xff] }
 0x24b   :  { %v818_v44 = vsub.f32 1.0, %v817_v56 }
 0x24c   :  { %v800_v54 = vmul.f32 %v1791_v39, %v799_v43 }
 0x24d   :  { %v819_v46 = vmul.f32 %v1793_v55, %v818_v44 }
 0x24e   :  { %v1795_v15 = vpop.eup %1794  ;;  %v801_v53 = vadd.f32 %v1791_v39, %v800_v54 }
 0x24f   :  { %v820_v38 = vadd.f32 %v1793_v55, %v819_v46  ;;  %v837_v51 = vmul.f32 %v1795_v15, %v835_v36  ;;  %v1797_v40 = vpop.eup %1796  ;;  %vm842_vm2 = vweird.f32 %v1795_v15  ;;  %v3308_v46 = vld [vmem:[#allocation21_spill] sm:$0xff] }
 0x250   :  { %v805_v56 = vsel %vm804_vm14, %v1791_v39, %v801_v53  ;;  %v845_v39 = vand.u32 2147483647, %v835_v36  ;;  %vm843_vm4 = vmor %vm841_vm3, %vm842_vm2  ;;  %v3307_v36 = vld [vmem:[#allocation27_spill] sm:$0xff]  ;;  %v2876_v53 = vld [vmem:[#allocation6 + $0x90] sm:$0xff] }
 0x251   :  { %v810_v50 = vsel %vm807_vm0, %v809_v49, %v805_v56  ;;  %v824_v43 = vsel %vm823_vm15, %v1793_v55, %v820_v38  ;;  %v838_v41 = vsub.f32 1.0, %v837_v51  ;;  %3309 = vst [vmem:[#allocation19_spill] sm:$0xff] %v2876_v53  ;;  %v3310_v49 = vld [vmem:[#allocation15_spill] sm:$0xff]  ;;  %v3311_v38 = vld [vmem:[#allocation20_spill] sm:$0xff]  ;;  %v2882_v56 = vld [vmem:[#allocation6 + $0x70] sm:$0xff] }
 0x252   :  { %v829_v44 = vsel %vm826_vm1, %v828_v42, %v824_v43  ;;  %v852_v37 = vmul.f32 %v1797_v40, %v810_v50  ;;  %vm846_vm5 = vcmp.eq.f32.partialorder %v845_v39, 8.507059e+37  ;;  %v2870_v50 = vld [vmem:[#allocation6 + $0xb0] sm:$0xff]  ;;  %3313 = vst [vmem:[#allocation28_spill] sm:$0xff] %v2882_v56  ;;  %v2885_v40 = vld [vmem:[#allocation6 + $0x78] sm:$0xff]  ;;  %v3315_v43 = vld [vmem:[#allocation25_spill] sm:$0xff] }
 0x253   :  { %v851_v33 = vmul.f32 %v829_v44, %v2651_v45  ;;  %v839_v54 = vmul.f32 %v1795_v15, %v838_v41  ;;  %v2864_v45 = vld [vmem:[#allocation6 + $0xd0] sm:$0xff]  ;;  %3305 = vst [vmem:[#allocation29_spill] sm:$0xff] %v2870_v50  ;;  %v2889_v44 = vld [vmem:[#allocation6 + $0x48] sm:$0xff] }
 0x254   :  { %3301 = vst [vmem:[#allocation33_spill] sm:$0xff] %v2864_v45  ;;  %v3304_v41 = vld [vmem:[#allocation14_spill] sm:$0xff]  ;;  %v2899_v39 = vld [vmem:[#allocation6 + $0x28] sm:$0xff] }
 0x255   :  { %v2823_v26 = vadd.f32 %v852_v37, %v851_v33  ;;  %v840_v47 = vadd.f32 %v1795_v15, %v839_v54  ;;  %v3302_v33 = vld [vmem:[#allocation23_spill] sm:$0xff]  ;;  %v3303_v37 = vld [vmem:[#allocation18_spill] sm:$0xff]  ;;  %3314 = vst [vmem:[#allocation36_spill] sm:$0xff] %v2885_v40 }
 0x256   :  { %v3312_v42 = vld [vmem:[#allocation30_spill] sm:$0xff]  ;;  %3316 = vst [vmem:[#allocation32_spill] sm:$0xff] %v2889_v44 }
 0x257   :  { %1798 = vtanh.f32 %v2823_v26  ;;  %v844_v58 = vsel %vm843_vm4, %v1795_v15, %v840_v47  ;;  %v3306_v15 = vld [vmem:[#allocation17_spill] sm:$0xff]  ;;  %v2892_v54 = vld [vmem:[#allocation6 + $0x50] sm:$0xff]  ;;  %v2895_v47 = vld [vmem:[#allocation6 + $0x58] sm:$0xff]  ;;  %3320 = vst [vmem:[#allocation37_spill] sm:$0xff] %v2899_v39 }
 0x258   :  { %v849_v51 = vsel %vm846_vm5, %v848_v34, %v844_v58  ;;  %3317 = vst [vmem:[#allocation22_spill] sm:$0xff] %v2892_v54  ;;  %v2902_v58 = vld [vmem:[#allocation6 + $0x30] sm:$0xff]  ;;  %v2905_v34 = vld [vmem:[#allocation6 + $0x38] sm:$0xff] }
 0x259   :  { %3318 = vst [vmem:[#allocation31_spill] sm:$0xff] %v2895_v47 }
 0x25a   :  { %3321 = vst [vmem:[#allocation35_spill] sm:$0xff] %v2902_v58 }
 0x25b   :  { %3322 = vst [vmem:[#allocation26_spill] sm:$0xff] %v2905_v34 }
 0x25d   :  { %v1799_v52 = vpop.eup %1798 }
 0x25e   :  { %v855_v55 = vmul.f32 %v1799_v52, %v849_v51  ;;  %v3323_v52 = vld [vmem:[#allocation24_spill] sm:$0xff]  ;;  %v2909_v51 = vld [vmem:[#allocation6 + $0x8] sm:$0xff] }
 0x25f   :  { %3324 = vst [vmem:[#allocation34_spill] sm:$0xff] %v2909_v51 }
 0x260   :  { %876 = vmatmul.f32.vlgmr.msra.gmra.mxu0 %v855_v55  ;;  %896 = vmatmul.f32.vlgmr.msrb.gmra.mxu1 %v855_v55 }
 0x261   :  { %916 = vmatmul.f32.vlgmr.msrb.gmra.mxu2 %v855_v55  ;;  %936 = vmatmul.f32.vlgmr.msrb.gmra.mxu3 %v855_v55  ;;  %v2912_v55 = vld [vmem:[#allocation6 + $0x10] sm:$0xff] }
 0x262   :  { %1162 = vmatpush.msra.mxu0 %v2654_v1  ;;  %1182 = vmatpush.msrb.mxu1 %v2657_v59  ;;  %3325 = vst [vmem:[#allocation39_spill] sm:$0xff] %v2912_v55 }
 0x263   :  { %1202 = vmatpush.msrb.mxu2 %v2660_v60  ;;  %1222 = vmatpush.msrb.mxu3 %v2663_v62 }
 0x264   :  { %1163 = vmatpush.msra.mxu0 %v2666_v3  ;;  %1183 = vmatpush.msrb.mxu1 %v2669_v10 }
 0x265   :  { %1203 = vmatpush.msrb.mxu2 %v2672_v5  ;;  %1223 = vmatpush.msrb.mxu3 %v2675_v22 }
 0x266   :  { %1164 = vmatpush.msra.mxu0 %v2678_v48  ;;  %1184 = vmatpush.msrb.mxu1 %v2681_v13 }
 0x267   :  { %1204 = vmatpush.msrb.mxu2 %v2684_v8  ;;  %1224 = vmatpush.msrb.mxu3 %v2687_v7 }
 0x268   :  { %1165 = vmatpush.msra.mxu0 %v2690_v12  ;;  %1185 = vmatpush.msrb.mxu1 %v2693_v20 }
 0x269   :  { %1205 = vmatpush.msrb.mxu2 %v2696_v35  ;;  %1225 = vmatpush.msrb.mxu3 %v2699_v14 }
 0x26a   :  { %1166 = vmatpush.msra.mxu0 %v2702_v18  ;;  %1186 = vmatpush.msrb.mxu1 %v2705_v57 }
 0x26b   :  { %1206 = vmatpush.msrb.mxu2 %v2708_v0  ;;  %1226 = vmatpush.msrb.mxu3 %v2711_v9 }
 0x26c   :  { %1167 = vmatpush.msra.mxu0 %v2714_v63  ;;  %1187 = vmatpush.msrb.mxu1 %v2717_v21 }
 0x26d   :  { %1207 = vmatpush.msrb.mxu2 %v2720_v17  ;;  %1227 = vmatpush.msrb.mxu3 %v2723_v23 }
 0x26e   :  { %1168 = vmatpush.msra.mxu0 %v2726_v11  ;;  %1188 = vmatpush.msrb.mxu1 %v2729_v61 }
 0x26f   :  { %1208 = vmatpush.msrb.mxu2 %v2732_v6  ;;  %1228 = vmatpush.msrb.mxu3 %v2735_v4 }
 0x270   :  { %1169 = vmatpush.msra.mxu0 %v2738_v2  ;;  %1189 = vmatpush.msrb.mxu1 %v2741_v16 }
 0x271   :  { %1209 = vmatpush.msrb.mxu2 %v2744_v19  ;;  %1229 = vmatpush.msrb.mxu3 %v2747_v24 }
 0x272   :  { %1170 = vmatpush.msra.mxu0 %v2750_v25  ;;  %1190 = vmatpush.msrb.mxu1 %v2753_v27 }
 0x273   :  { %1210 = vmatpush.msrb.mxu2 %v2756_v28  ;;  %1230 = vmatpush.msrb.mxu3 %v2759_v29 }
 0x274   :  { %1171 = vmatpush.msra.mxu0 %v2762_v31  ;;  %1191 = vmatpush.msrb.mxu1 %v2765_v32 }
 0x275   :  { %1211 = vmatpush.msrb.mxu2 %v2864_v45  ;;  %1231 = vmatpush.msrb.mxu3 %v3302_v33 }
 0x276   :  { %1172 = vmatpush.msra.mxu0 %v3303_v37  ;;  %1192 = vmatpush.msrb.mxu1 %v3304_v41 }
 0x277   :  { %1212 = vmatpush.msrb.mxu2 %v2870_v50  ;;  %1232 = vmatpush.msrb.mxu3 %v3306_v15 }
 0x278   :  { %1173 = vmatpush.msra.mxu0 %v3307_v36  ;;  %1193 = vmatpush.msrb.mxu1 %v3308_v46 }
 0x279   :  { %1213 = vmatpush.msrb.mxu2 %v2876_v53  ;;  %1233 = vmatpush.msrb.mxu3 %v3310_v49 }
 0x27a   :  { %1174 = vmatpush.msra.mxu0 %v3311_v38  ;;  %1194 = vmatpush.msrb.mxu1 %v3312_v42 }
 0x27b   :  { %1214 = vmatpush.msrb.mxu2 %v2882_v56  ;;  %1234 = vmatpush.msrb.mxu3 %v2885_v40 }
 0x27c   :  { %1175 = vmatpush.msra.mxu0 %v3315_v43  ;;  %1195 = vmatpush.msrb.mxu1 %v2889_v44  ;;  %v3328_v44 = vld [vmem:[#allocation52_spill] sm:$0xff] }
 0x27d   :  { %1215 = vmatpush.msrb.mxu2 %v2892_v54  ;;  %1235 = vmatpush.msrb.mxu3 %v2895_v47  ;;  %v3327_v47 = vld [vmem:[#allocation47_spill] sm:$0xff] }
 0x27e   :  { %1176 = vmatpush.msra.mxu0 %v3319_v30  ;;  %1196 = vmatpush.msrb.mxu1 %v2899_v39  ;;  %v2915_v30 = vld [vmem:[#allocation6 + $0x18] sm:$0xff] }
 0x27f   :  { %1216 = vmatpush.msrb.mxu2 %v2902_v58  ;;  %1236 = vmatpush.msrb.mxu3 %v2905_v34  ;;  %3326 = vst [vmem:[#allocation38_spill] sm:$0xff] %v2915_v30 }
 0x280   :  { %1177 = vmatpush.msra.mxu0 %v3323_v52  ;;  %1197 = vmatpush.msrb.mxu1 %v2909_v51  ;;  %v3329_v51 = vld [vmem:[#allocation54_spill] sm:$0xff] }
 0x281   :  { %1217 = vmatpush.msrb.mxu2 %v2912_v55  ;;  %1237 = vmatpush.msrb.mxu3 %v2915_v30 }
 0x2dd   :  { %v877_v39 = vpop.f32.mrf.mxu0  ;;  %v897_v58 = vpop.f32.mrf.mxu1 }
 0x2de   :  { %v940_v54 = vadd.f32 %v877_v39, %v3327_v47  ;;  %v941_v34 = vadd.f32 %v897_v58, %v3328_v44  ;;  %v3330_v44 = vld [vmem:[#allocation53_spill] sm:$0xff] }
 0x2e0   :  { %v1715_v43 = vmul.f32 -1.442695, %v940_v54  ;;  %v1716_v52 = vmul.f32 -1.442695, %v941_v34 }
 0x2e2   :  { %1800 = vpow2.f32 %v1715_v43 }
 0x2e3   :  { %1802 = vpow2.f32 %v1716_v52 }
 0x2e4   :  { %v937_v40 = vpop.f32.mrf.mxu3  ;;  %v917_v30 = vpop.f32.mrf.mxu2 }
 0x2e5   :  { %v943_v56 = vadd.f32 %v937_v40, %v3329_v51  ;;  %v942_v54 = vadd.f32 %v917_v30, %v3330_v44 }
 0x2e7   :  { %v1717_v42 = vmul.f32 -1.442695, %v943_v56 }
 0x2e8   :  { %v1801_v38 = vpop.eup %1800 }
 0x2e9   :  { %v1803_v55 = vpop.eup %1802  ;;  %v947_v49 = vadd.f32 1.0, %v1801_v38  ;;  %1804 = vpow2.f32 %v1717_v42 }
 0x2ea   :  { %v966_v53 = vadd.f32 1.0, %v1803_v55 }
 0x2eb   :  { %1806 = vrcp.f32 %v947_v49  ;;  %v959_v56 = vand.u32 2147483648, %v947_v49  ;;  %v957_v42 = vand.u32 2147483647, %v947_v49  ;;  %vm953_vm8 = vweird.f32 %v947_v49 }
 0x2ec   :  { %1808 = vrcp.f32 %v966_v53  ;;  %v978_v51 = vand.u32 2147483648, %v966_v53  ;;  %v976_v36 = vand.u32 2147483647, %v966_v53  ;;  %vm972_vm9 = vweird.f32 %v966_v53 }
 0x2ed   :  { %v960_v30 = vor.u32 1.1754944e-38, %v959_v56  ;;  %vm958_vm12 = vcmp.eq.f32.partialorder %v957_v42, 8.507059e+37 }
 0x2ee   :  { %vm977_vm13 = vcmp.eq.f32.partialorder %v976_v36, 8.507059e+37 }
 0x2ef   :  { %v1805_v46 = vpop.eup %1804 }
 0x2f0   :  { %v986_v47 = vadd.f32 1.0, %v1805_v46 }
 0x2f1   :  { %v1807_v39 = vpop.eup %1806 }
 0x2f2   :  { %v1809_v58 = vpop.eup %1808  ;;  %v949_v43 = vmul.f32 %v1807_v39, %v947_v49  ;;  %1810 = vrcp.f32 %v986_v47  ;;  %vm954_vm6 = vweird.f32 %v1807_v39  ;;  %v998_v56 = vand.u32 2147483648, %v986_v47 }
 0x2f3   :  { %v968_v34 = vmul.f32 %v1809_v58, %v966_v53  ;;  %1812 = vtanh.f32 %v942_v54  ;;  %vm973_vm7 = vweird.f32 %v1809_v58  ;;  %vm955_vm10 = vmor %vm953_vm8, %vm954_vm6  ;;  %vm992_vm15 = vweird.f32 %v986_v47 }
 0x2f4   :  { %v950_v52 = vsub.f32 1.0, %v949_v43  ;;  %vm974_vm11 = vmor %vm972_vm9, %vm973_vm7  ;;  %v979_v43 = vor.u32 1.1754944e-38, %v978_v51  ;;  %v999_v42 = vor.u32 1.1754944e-38, %v998_v56  ;;  %v3349_v56 = vld [vmem:[#allocation16_spill] sm:$0xff] }
 0x2f5   :  { %v969_v40 = vsub.f32 1.0, %v968_v34 }
 0x2f6   :  { %v951_v38 = vmul.f32 %v1807_v39, %v950_v52 }
 0x2f7   :  { %v970_v55 = vmul.f32 %v1809_v58, %v969_v40 }
 0x2f8   :  { %v1811_v15 = vpop.eup %1810  ;;  %v952_v46 = vadd.f32 %v1807_v39, %v951_v38 }
 0x2f9   :  { %v971_v44 = vadd.f32 %v1809_v58, %v970_v55  ;;  %v988_v50 = vmul.f32 %v1811_v15, %v986_v47  ;;  %v1813_v54 = vpop.eup %1812  ;;  %vm993_vm14 = vweird.f32 %v1811_v15  ;;  %v3338_v55 = vld [vmem:[#allocation21_spill] sm:$0xff] }
 0x2fa   :  { %v956_v34 = vsel %vm955_vm10, %v1807_v39, %v952_v46  ;;  %v996_v39 = vand.u32 2147483647, %v986_v47  ;;  %vm994_vm0 = vmor %vm992_vm15, %vm993_vm14  ;;  %v3337_v47 = vld [vmem:[#allocation27_spill] sm:$0xff] }
 0x2fb   :  { %v961_v41 = vsel %vm958_vm12, %v960_v30, %v956_v34  ;;  %v975_v52 = vsel %vm974_vm11, %v1809_v58, %v971_v44  ;;  %v989_v37 = vsub.f32 1.0, %v988_v50  ;;  %v3339_v46 = vld [vmem:[#allocation19_spill] sm:$0xff]  ;;  %v3341_v44 = vld [vmem:[#allocation20_spill] sm:$0xff] }
 0x2fc   :  { %v980_v40 = vsel %vm977_vm13, %v979_v43, %v975_v52  ;;  %v1003_v33 = vmul.f32 %v1813_v54, %v961_v41  ;;  %vm997_vm1 = vcmp.eq.f32.partialorder %v996_v39, 8.507059e+37  ;;  %v3335_v41 = vld [vmem:[#allocation29_spill] sm:$0xff]  ;;  %v3340_v30 = vld [vmem:[#allocation15_spill] sm:$0xff]  ;;  %v3342_v43 = vld [vmem:[#allocation30_spill] sm:$0xff] }
 0x2fd   :  { %v1002_v45 = vmul.f32 %v980_v40, %v2823_v26  ;;  %v990_v38 = vmul.f32 %v1811_v15, %v989_v37  ;;  %v3331_v26 = vld [vmem:[#allocation33_spill] sm:$0xff]  ;;  %v3334_v37 = vld [vmem:[#allocation14_spill] sm:$0xff]  ;;  %v3343_v34 = vld [vmem:[#allocation28_spill] sm:$0xff] }
 0x2fe   :  { %v3344_v54 = vld [vmem:[#allocation36_spill] sm:$0xff]  ;;  %v3345_v52 = vld [vmem:[#allocation25_spill] sm:$0xff] }
 0x2ff   :  { %v2923_v49 = vadd.f32 %v1003_v33, %v1002_v45  ;;  %v991_v53 = vadd.f32 %v1811_v15, %v990_v38  ;;  %v3332_v45 = vld [vmem:[#allocation23_spill] sm:$0xff]  ;;  %v3333_v33 = vld [vmem:[#allocation18_spill] sm:$0xff]  ;;  %v3346_v40 = vld [vmem:[#allocation32_spill] sm:$0xff] }
 0x300   :  { %v3347_v38 = vld [vmem:[#allocation22_spill] sm:$0xff]  ;;  %v3350_v39 = vld [vmem:[#allocation37_spill] sm:$0xff] }
 0x301   :  { %1814 = vtanh.f32 %v2923_v49  ;;  %v995_v51 = vsel %vm994_vm0, %v1811_v15, %v991_v53  ;;  %v3336_v15 = vld [vmem:[#allocation17_spill] sm:$0xff]  ;;  %v3348_v53 = vld [vmem:[#allocation31_spill] sm:$0xff] }
 0x302   :  { %v1000_v50 = vsel %vm997_vm1, %v999_v42, %v995_v51  ;;  %v3351_v51 = vld [vmem:[#allocation35_spill] sm:$0xff]  ;;  %v3352_v42 = vld [vmem:[#allocation26_spill] sm:$0xff] }
 0x307   :  { %v1815_v36 = vpop.eup %1814 }
 0x308   :  { %v1006_v58 = vmul.f32 %v1815_v36, %v1000_v50  ;;  %v3353_v36 = vld [vmem:[#allocation24_spill] sm:$0xff]  ;;  %v3354_v50 = vld [vmem:[#allocation34_spill] sm:$0xff] }
 0x30a   :  { %1027 = vmatmul.f32.vlgmr.msrb.gmra.mxu0 %v1006_v58  ;;  %1047 = vmatmul.f32.vlgmr.msra.gmra.mxu1 %v1006_v58 }
 0x30b   :  { %1067 = vmatmul.f32.vlgmr.msra.gmra.mxu2 %v1006_v58  ;;  %1087 = vmatmul.f32.vlgmr.msra.gmra.mxu3 %v1006_v58  ;;  %v3355_v58 = vld [vmem:[#allocation39_spill] sm:$0xff] }
 0x30c   :  { %1313 = vmatpush.msrb.mxu0 %v2654_v1  ;;  %1333 = vmatpush.msra.mxu1 %v2657_v59 }
 0x30d   :  { %1353 = vmatpush.msra.mxu2 %v2660_v60  ;;  %1373 = vmatpush.msra.mxu3 %v2663_v62 }
 0x30e   :  { %1314 = vmatpush.msrb.mxu0 %v2666_v3  ;;  %1334 = vmatpush.msra.mxu1 %v2669_v10 }
 0x30f   :  { %1354 = vmatpush.msra.mxu2 %v2672_v5  ;;  %1374 = vmatpush.msra.mxu3 %v2675_v22 }
 0x310   :  { %1315 = vmatpush.msrb.mxu0 %v2678_v48  ;;  %1335 = vmatpush.msra.mxu1 %v2681_v13 }
 0x311   :  { %1355 = vmatpush.msra.mxu2 %v2684_v8  ;;  %1375 = vmatpush.msra.mxu3 %v2687_v7 }
 0x312   :  { %1316 = vmatpush.msrb.mxu0 %v2690_v12  ;;  %1336 = vmatpush.msra.mxu1 %v2693_v20 }
 0x313   :  { %1356 = vmatpush.msra.mxu2 %v2696_v35  ;;  %1376 = vmatpush.msra.mxu3 %v2699_v14 }
 0x314   :  { %1317 = vmatpush.msrb.mxu0 %v2702_v18  ;;  %1337 = vmatpush.msra.mxu1 %v2705_v57 }
 0x315   :  { %1357 = vmatpush.msra.mxu2 %v2708_v0  ;;  %1377 = vmatpush.msra.mxu3 %v2711_v9 }
 0x316   :  { %1318 = vmatpush.msrb.mxu0 %v2714_v63  ;;  %1338 = vmatpush.msra.mxu1 %v2717_v21 }
 0x317   :  { %1358 = vmatpush.msra.mxu2 %v2720_v17  ;;  %1378 = vmatpush.msra.mxu3 %v2723_v23 }
 0x318   :  { %1319 = vmatpush.msrb.mxu0 %v2726_v11  ;;  %1339 = vmatpush.msra.mxu1 %v2729_v61 }
 0x319   :  { %1359 = vmatpush.msra.mxu2 %v2732_v6  ;;  %1379 = vmatpush.msra.mxu3 %v2735_v4 }
 0x31a   :  { %1320 = vmatpush.msrb.mxu0 %v2738_v2  ;;  %1340 = vmatpush.msra.mxu1 %v2741_v16 }
 0x31b   :  { %1360 = vmatpush.msra.mxu2 %v2744_v19  ;;  %1380 = vmatpush.msra.mxu3 %v2747_v24 }
 0x31c   :  { %1321 = vmatpush.msrb.mxu0 %v2750_v25  ;;  %1341 = vmatpush.msra.mxu1 %v2753_v27 }
 0x31d   :  { %1361 = vmatpush.msra.mxu2 %v2756_v28  ;;  %1381 = vmatpush.msra.mxu3 %v2759_v29 }
 0x31e   :  { %1322 = vmatpush.msrb.mxu0 %v2762_v31  ;;  %1342 = vmatpush.msra.mxu1 %v2765_v32 }
 0x31f   :  { %1362 = vmatpush.msra.mxu2 %v3331_v26  ;;  %1382 = vmatpush.msra.mxu3 %v3332_v45 }
 0x320   :  { %1323 = vmatpush.msrb.mxu0 %v3333_v33  ;;  %1343 = vmatpush.msra.mxu1 %v3334_v37 }
 0x321   :  { %1363 = vmatpush.msra.mxu2 %v3335_v41  ;;  %1383 = vmatpush.msra.mxu3 %v3336_v15 }
 0x322   :  { %1324 = vmatpush.msrb.mxu0 %v3337_v47  ;;  %1344 = vmatpush.msra.mxu1 %v3338_v55 }
 0x323   :  { %1364 = vmatpush.msra.mxu2 %v3339_v46  ;;  %1384 = vmatpush.msra.mxu3 %v3340_v30 }
 0x324   :  { %1325 = vmatpush.msrb.mxu0 %v3341_v44  ;;  %1345 = vmatpush.msra.mxu1 %v3342_v43 }
 0x325   :  { %1365 = vmatpush.msra.mxu2 %v3343_v34  ;;  %1385 = vmatpush.msra.mxu3 %v3344_v54  ;;  %v3357_v54 = vld [vmem:[#allocation51_spill] sm:$0xff] }
 0x326   :  { %1326 = vmatpush.msrb.mxu0 %v3345_v52  ;;  %1346 = vmatpush.msra.mxu1 %v3346_v40  ;;  %v3356_v52 = vld [vmem:[#allocation38_spill] sm:$0xff]  ;;  %v3358_v34 = vld [vmem:[#allocation55_spill] sm:$0xff] }
 0x327   :  { %1366 = vmatpush.msra.mxu2 %v3347_v38  ;;  %1386 = vmatpush.msra.mxu3 %v3348_v53 }
 0x328   :  { %1327 = vmatpush.msrb.mxu0 %v3349_v56  ;;  %1347 = vmatpush.msra.mxu1 %v3350_v39 }
 0x329   :  { %1367 = vmatpush.msra.mxu2 %v3351_v51  ;;  %1387 = vmatpush.msra.mxu3 %v3352_v42  ;;  %v3359_v42 = vld [vmem:[#allocation57_spill] sm:$0xff] }
 0x32a   :  { %1328 = vmatpush.msrb.mxu0 %v3353_v36  ;;  %1348 = vmatpush.msra.mxu1 %v3354_v50 }
 0x32b   :  { %1368 = vmatpush.msra.mxu2 %v3355_v58  ;;  %1388 = vmatpush.msra.mxu3 %v3356_v52 }
 0x387   :  { %v1028_v40 = vpop.f32.mrf.mxu0  ;;  %v1048_v38 = vpop.f32.mrf.mxu1 }
 0x388   :  { %v1091_v53 = vadd.f32 %v1028_v40, %v3357_v54  ;;  %v1092_v56 = vadd.f32 %v1048_v38, %v3358_v34  ;;  %v3360_v34 = vld [vmem:[#allocation56_spill] sm:$0xff] }
 0x38a   :  { %v1718_v43 = vmul.f32 -1.442695, %v1091_v53  ;;  %v1719_v39 = vmul.f32 -1.442695, %v1092_v56 }
 0x38c   :  { %1816 = vpow2.f32 %v1718_v43 }
 0x38d   :  { %1818 = vpow2.f32 %v1719_v39 }
 0x38e   :  { %v1088_v51 = vpop.f32.mrf.mxu3  ;;  %v1068_v52 = vpop.f32.mrf.mxu2 }
 0x38f   :  { %v1094_v44 = vadd.f32 %v1088_v51, %v3359_v42  ;;  %v1093_v38 = vadd.f32 %v1068_v52, %v3360_v34 }
 0x391   :  { %v1720_v36 = vmul.f32 -1.442695, %v1094_v44 }
 0x392   :  { %v1817_v30 = vpop.eup %1816 }
 0x393   :  { %v1819_v50 = vpop.eup %1818  ;;  %v1098_v46 = vadd.f32 1.0, %v1817_v30  ;;  %1820 = vpow2.f32 %v1720_v36 }
 0x394   :  { %v1117_v58 = vadd.f32 1.0, %v1819_v50 }
 0x395   :  { %1822 = vrcp.f32 %v1098_v46  ;;  %v1110_v44 = vand.u32 2147483648, %v1098_v46  ;;  %v1108_v36 = vand.u32 2147483647, %v1098_v46  ;;  %vm1104_vm4 = vweird.f32 %v1098_v46 }
 0x396   :  { %1824 = vrcp.f32 %v1117_v58  ;;  %v1129_v42 = vand.u32 2147483648, %v1117_v58  ;;  %v1127_v47 = vand.u32 2147483647, %v1117_v58  ;;  %vm1123_vm5 = vweird.f32 %v1117_v58 }
 0x397   :  { %v1111_v52 = vor.u32 1.1754944e-38, %v1110_v44  ;;  %vm1109_vm8 = vcmp.eq.f32.partialorder %v1108_v36, 8.507059e+37 }
 0x398   :  { %vm1128_vm9 = vcmp.eq.f32.partialorder %v1127_v47, 8.507059e+37 }
 0x399   :  { %v1821_v55 = vpop.eup %1820 }
 0x39a   :  { %v1137_v54 = vadd.f32 1.0, %v1821_v55 }
 0x39b   :  { %v1823_v40 = vpop.eup %1822 }
 0x39c   :  { %v1825_v53 = vpop.eup %1824  ;;  %v1100_v43 = vmul.f32 %v1823_v40, %v1098_v46  ;;  %1826 = vrcp.f32 %v1137_v54  ;;  %vm1105_vm2 = vweird.f32 %v1823_v40  ;;  %v1149_v44 = vand.u32 2147483648, %v1137_v54 }
 0x39d   :  { %v1119_v56 = vmul.f32 %v1825_v53, %v1117_v58  ;;  %1828 = vtanh.f32 %v1093_v38  ;;  %vm1124_vm3 = vweird.f32 %v1825_v53  ;;  %vm1106_vm6 = vmor %vm1104_vm4, %vm1105_vm2  ;;  %vm1143_vm11 = vweird.f32 %v1137_v54 }
 0x39e   :  { %v1101_v39 = vsub.f32 1.0, %v1100_v43  ;;  %vm1125_vm7 = vmor %vm1123_vm5, %vm1124_vm3  ;;  %v1130_v43 = vor.u32 1.1754944e-38, %v1129_v42  ;;  %v1150_v36 = vor.u32 1.1754944e-38, %v1149_v44 }
 0x39f   :  { %v1120_v51 = vsub.f32 1.0, %v1119_v56 }
 0x3a0   :  { %v1102_v30 = vmul.f32 %v1823_v40, %v1101_v39 }
 0x3a1   :  { %v1121_v50 = vmul.f32 %v1825_v53, %v1120_v51 }
 0x3a2   :  { %v1827_v15 = vpop.eup %1826  ;;  %v1103_v55 = vadd.f32 %v1823_v40, %v1102_v30 }
 0x3a3   :  { %v1122_v34 = vadd.f32 %v1825_v53, %v1121_v50  ;;  %v1139_v41 = vmul.f32 %v1827_v15, %v1137_v54  ;;  %v1829_v38 = vpop.eup %1828  ;;  %vm1144_vm10 = vweird.f32 %v1827_v15 }
 0x3a4   :  { %v1107_v56 = vsel %vm1106_vm6, %v1823_v40, %v1103_v55  ;;  %v1147_v40 = vand.u32 2147483647, %v1137_v54  ;;  %vm1145_vm12 = vmor %vm1143_vm11, %vm1144_vm10  ;;  %v3390_v55 = vld [vmem:[#allocation59_spill] sm:$0xff] }
 0x3a5   :  { %v1112_v37 = vsel %vm1109_vm8, %v1111_v52, %v1107_v56  ;;  %v1126_v39 = vsel %vm1125_vm7, %v1825_v53, %v1122_v34  ;;  %v1140_v33 = vsub.f32 1.0, %v1139_v41 }
 0x3a6   :  { %v1131_v51 = vsel %vm1128_vm9, %v1130_v43, %v1126_v39  ;;  %v1154_v45 = vmul.f32 %v1829_v38, %v1112_v37  ;;  %vm1148_vm13 = vcmp.eq.f32.partialorder %v1147_v40, 8.507059e+37 }
 0x3a7   :  { %v1153_v26 = vmul.f32 %v1131_v51, %v2923_v49  ;;  %v1141_v30 = vmul.f32 %v1827_v15, %v1140_v33 }
 0x3a9   :  { %v2995_v46 = vadd.f32 %v1154_v45, %v1153_v26  ;;  %v1142_v58 = vadd.f32 %v1827_v15, %v1141_v30 }
 0x3ab   :  { %1830 = vtanh.f32 %v2995_v46  ;;  %v1146_v42 = vsel %vm1145_vm12, %v1827_v15, %v1142_v58 }
 0x3ac   :  { %v1151_v41 = vsel %vm1148_vm13, %v1150_v36, %v1146_v42 }
 0x3b1   :  { %v1831_v47 = vpop.eup %1830 }
 0x3b2   :  { %v1157_v53 = vmul.f32 %v1831_v47, %v1151_v41 }
 0x3b4   :  { %1178 = vmatmul.f32.vlgmr.msra.gmra.mxu0 %v1157_v53  ;;  %1198 = vmatmul.f32.vlgmr.msrb.gmra.mxu1 %v1157_v53 }
 0x3b5   :  { %1218 = vmatmul.f32.vlgmr.msrb.gmra.mxu2 %v1157_v53  ;;  %1238 = vmatmul.f32.vlgmr.msrb.gmra.mxu3 %v1157_v53 }
 0x3b6   :  { %1464 = vmatpush.msra.mxu0 %v2654_v1  ;;  %1484 = vmatpush.msrb.mxu1 %v2657_v59  ;;  %v3361_v1 = vld [vmem:[#allocation33_spill] sm:$0xff]  ;;  %v3362_v59 = vld [vmem:[#allocation23_spill] sm:$0xff] }
 0x3b7   :  { %1504 = vmatpush.msrb.mxu2 %v2660_v60  ;;  %1524 = vmatpush.msrb.mxu3 %v2663_v62  ;;  %v3363_v60 = vld [vmem:[#allocation18_spill] sm:$0xff] }
 0x3b8   :  { %1465 = vmatpush.msra.mxu0 %v2666_v3  ;;  %1485 = vmatpush.msrb.mxu1 %v2669_v10  ;;  %v3364_v62 = vld [vmem:[#allocation14_spill] sm:$0xff]  ;;  %v3365_v3 = vld [vmem:[#allocation29_spill] sm:$0xff] }
 0x3b9   :  { %1505 = vmatpush.msrb.mxu2 %v2672_v5  ;;  %1525 = vmatpush.msrb.mxu3 %v2675_v22  ;;  %v3366_v10 = vld [vmem:[#allocation17_spill] sm:$0xff]  ;;  %v3367_v5 = vld [vmem:[#allocation27_spill] sm:$0xff] }
 0x3ba   :  { %1466 = vmatpush.msra.mxu0 %v2678_v48  ;;  %1486 = vmatpush.msrb.mxu1 %v2681_v13  ;;  %v3368_v22 = vld [vmem:[#allocation21_spill] sm:$0xff]  ;;  %v3369_v48 = vld [vmem:[#allocation19_spill] sm:$0xff] }
 0x3bb   :  { %1506 = vmatpush.msrb.mxu2 %v2684_v8  ;;  %1526 = vmatpush.msrb.mxu3 %v2687_v7  ;;  %v3370_v13 = vld [vmem:[#allocation15_spill] sm:$0xff]  ;;  %v3371_v8 = vld [vmem:[#allocation20_spill] sm:$0xff]  ;;  %v3372_v7 = vld [vmem:[#allocation30_spill] sm:$0xff] }
 0x3bc   :  { %1467 = vmatpush.msra.mxu0 %v2690_v12  ;;  %1487 = vmatpush.msrb.mxu1 %v2693_v20  ;;  %v3373_v12 = vld [vmem:[#allocation28_spill] sm:$0xff] }
 0x3bd   :  { %1507 = vmatpush.msrb.mxu2 %v2696_v35  ;;  %1527 = vmatpush.msrb.mxu3 %v2699_v14  ;;  %v3374_v20 = vld [vmem:[#allocation36_spill] sm:$0xff]  ;;  %v3375_v35 = vld [vmem:[#allocation25_spill] sm:$0xff] }
 0x3be   :  { %1468 = vmatpush.msra.mxu0 %v2702_v18  ;;  %1488 = vmatpush.msrb.mxu1 %v2705_v57  ;;  %v3376_v14 = vld [vmem:[#allocation32_spill] sm:$0xff]  ;;  %v3377_v18 = vld [vmem:[#allocation22_spill] sm:$0xff]  ;;  %v3378_v57 = vld [vmem:[#allocation31_spill] sm:$0xff] }
 0x3bf   :  { %1508 = vmatpush.msrb.mxu2 %v2708_v0  ;;  %1528 = vmatpush.msrb.mxu3 %v2711_v9  ;;  %v3379_v0 = vld [vmem:[#allocation16_spill] sm:$0xff]  ;;  %v3380_v9 = vld [vmem:[#allocation37_spill] sm:$0xff] }
 0x3c0   :  { %1469 = vmatpush.msra.mxu0 %v2714_v63  ;;  %1489 = vmatpush.msrb.mxu1 %v2717_v21  ;;  %v3381_v63 = vld [vmem:[#allocation35_spill] sm:$0xff]  ;;  %v3382_v21 = vld [vmem:[#allocation26_spill] sm:$0xff] }
 0x3c1   :  { %1509 = vmatpush.msrb.mxu2 %v2720_v17  ;;  %1529 = vmatpush.msrb.mxu3 %v2723_v23  ;;  %v3383_v17 = vld [vmem:[#allocation24_spill] sm:$0xff]  ;;  %v3384_v23 = vld [vmem:[#allocation34_spill] sm:$0xff] }
 0x3c2   :  { %1470 = vmatpush.msra.mxu0 %v2726_v11  ;;  %1490 = vmatpush.msrb.mxu1 %v2729_v61  ;;  %v3385_v11 = vld [vmem:[#allocation39_spill] sm:$0xff]  ;;  %v3386_v61 = vld [vmem:[#allocation38_spill] sm:$0xff] }
 0x3c3   :  { %1510 = vmatpush.msrb.mxu2 %v2732_v6  ;;  %1530 = vmatpush.msrb.mxu3 %v2735_v4 }
 0x3c4   :  { %1471 = vmatpush.msra.mxu0 %v2738_v2  ;;  %1491 = vmatpush.msrb.mxu1 %v2741_v16  ;;  %v3387_v2 = vld [vmem:[#allocation13_spill] sm:$0xff] }
 0x3c5   :  { %1511 = vmatpush.msrb.mxu2 %v2744_v19  ;;  %1531 = vmatpush.msrb.mxu3 %v2747_v24  ;;  %v3388_v19 = vld [vmem:[#allocation58_spill] sm:$0xff] }
 0x3c6   :  { %1472 = vmatpush.msra.mxu0 %v2750_v25  ;;  %1492 = vmatpush.msrb.mxu1 %v2753_v27 }
 0x3c7   :  { %1512 = vmatpush.msrb.mxu2 %v2756_v28  ;;  %1532 = vmatpush.msrb.mxu3 %v2759_v29  ;;  %v3389_v29 = vld [vmem:[#allocation60_spill] sm:$0xff] }
 0x3c8   :  { %1473 = vmatpush.msra.mxu0 %v2762_v31  ;;  %1493 = vmatpush.msrb.mxu1 %v2765_v32 }
 0x3c9   :  { %1513 = vmatpush.msrb.mxu2 %v3361_v1  ;;  %1533 = vmatpush.msrb.mxu3 %v3362_v59 }
 0x3ca   :  { %1474 = vmatpush.msra.mxu0 %v3363_v60  ;;  %1494 = vmatpush.msrb.mxu1 %v3364_v62 }
 0x3cb   :  { %1514 = vmatpush.msrb.mxu2 %v3365_v3  ;;  %1534 = vmatpush.msrb.mxu3 %v3366_v10 }
 0x3cc   :  { %1475 = vmatpush.msra.mxu0 %v3367_v5  ;;  %1495 = vmatpush.msrb.mxu1 %v3368_v22 }
 0x3cd   :  { %1515 = vmatpush.msrb.mxu2 %v3369_v48  ;;  %1535 = vmatpush.msrb.mxu3 %v3370_v13 }
 0x3ce   :  { %1476 = vmatpush.msra.mxu0 %v3371_v8  ;;  %1496 = vmatpush.msrb.mxu1 %v3372_v7 }
 0x3cf   :  { %1516 = vmatpush.msrb.mxu2 %v3373_v12  ;;  %1536 = vmatpush.msrb.mxu3 %v3374_v20 }
 0x3d0   :  { %1477 = vmatpush.msra.mxu0 %v3375_v35  ;;  %1497 = vmatpush.msrb.mxu1 %v3376_v14 }
 0x3d1   :  { %1517 = vmatpush.msrb.mxu2 %v3377_v18  ;;  %1537 = vmatpush.msrb.mxu3 %v3378_v57 }
 0x3d2   :  { %1478 = vmatpush.msra.mxu0 %v3379_v0  ;;  %1498 = vmatpush.msrb.mxu1 %v3380_v9 }
 0x3d3   :  { %1518 = vmatpush.msrb.mxu2 %v3381_v63  ;;  %1538 = vmatpush.msrb.mxu3 %v3382_v21  ;;  %v3391_v21 = vld [vmem:[#allocation40_spill] sm:$0xff] }
 0x3d4   :  { %1479 = vmatpush.msra.mxu0 %v3383_v17  ;;  %1499 = vmatpush.msrb.mxu1 %v3384_v23  ;;  %v3392_v23 = vld [vmem:[#allocation61_spill] sm:$0xff] }
 0x3d5   :  { %1519 = vmatpush.msrb.mxu2 %v3385_v11  ;;  %1539 = vmatpush.msrb.mxu3 %v3386_v61 }
 0x431   :  { %v1179_v6 = vpop.f32.mrf.mxu0  ;;  %v1199_v4 = vpop.f32.mrf.mxu1 }
 0x432   :  { %v1242_v16 = vadd.f32 %v1179_v6, %v3387_v2  ;;  %v1243_v24 = vadd.f32 %v1199_v4, %v3388_v19  ;;  %v3393_v2 = vld [vmem:[#allocation63_spill] sm:$0xff] }
 0x434   :  { %v1721_v25 = vmul.f32 -1.442695, %v1242_v16  ;;  %v1722_v27 = vmul.f32 -1.442695, %v1243_v24 }
 0x436   :  { %1832 = vpow2.f32 %v1721_v25 }
 0x437   :  { %1834 = vpow2.f32 %v1722_v27 }
 0x438   :  { %v1239_v28 = vpop.f32.mrf.mxu3  ;;  %v1219_v37 = vpop.f32.mrf.mxu2 }
 0x439   :  { %v1245_v31 = vadd.f32 %v1239_v28, %v3389_v29  ;;  %v1244_v52 = vadd.f32 %v1219_v37, %v3390_v55 }
 0x43b   :  { %v1723_v32 = vmul.f32 -1.442695, %v1245_v31 }
 0x43c   :  { %v1833_v49 = vpop.eup %1832 }
 0x43d   :  { %v1835_v26 = vpop.eup %1834  ;;  %v1249_v45 = vadd.f32 1.0, %v1833_v49  ;;  %1836 = vpow2.f32 %v1723_v32 }
 0x43e   :  { %v1268_v33 = vadd.f32 1.0, %v1835_v26  ;;  %v3394_v26 = vld [vmem:[#allocation62_spill] sm:$0xff] }
 0x43f   :  { %1838 = vrcp.f32 %v1249_v45  ;;  %v1261_v51 = vand.u32 2147483648, %v1249_v45  ;;  %v1259_v44 = vand.u32 2147483647, %v1249_v45  ;;  %vm1255_vm0 = vweird.f32 %v1249_v45 }
 0x440   :  { %1840 = vrcp.f32 %v1268_v33  ;;  %v1280_v30 = vand.u32 2147483648, %v1268_v33  ;;  %v1278_v42 = vand.u32 2147483647, %v1268_v33  ;;  %vm1274_vm1 = vweird.f32 %v1268_v33 }
 0x441   :  { %v1262_v41 = vor.u32 1.1754944e-38, %v1261_v51  ;;  %vm1260_vm4 = vcmp.eq.f32.partialorder %v1259_v44, 8.507059e+37 }
 0x442   :  { %v1281_v59 = vor.u32 1.1754944e-38, %v1280_v30  ;;  %vm1279_vm5 = vcmp.eq.f32.partialorder %v1278_v42, 8.507059e+37 }
 0x443   :  { %v1837_v15 = vpop.eup %1836 }
 0x444   :  { %v1288_v54 = vadd.f32 1.0, %v1837_v15 }
 0x445   :  { %v1839_v50 = vpop.eup %1838 }
 0x446   :  { %v1841_v34 = vpop.eup %1840  ;;  %v1251_v43 = vmul.f32 %v1839_v50, %v1249_v45  ;;  %1842 = vrcp.f32 %v1288_v54  ;;  %vm1256_vm14 = vweird.f32 %v1839_v50  ;;  %v1300_v20 = vand.u32 2147483648, %v1288_v54 }
 0x447   :  { %v1270_v56 = vmul.f32 %v1841_v34, %v1268_v33  ;;  %1844 = vtanh.f32 %v1244_v52  ;;  %vm1275_vm15 = vweird.f32 %v1841_v34  ;;  %vm1257_vm2 = vmor %vm1255_vm0, %vm1256_vm14  ;;  %vm1294_vm7 = vweird.f32 %v1288_v54 }
 0x448   :  { %v1252_v38 = vsub.f32 1.0, %v1251_v43  ;;  %vm1276_vm3 = vmor %vm1274_vm1, %vm1275_vm15  ;;  %v1298_v35 = vand.u32 2147483647, %v1288_v54  ;;  %v1301_v18 = vor.u32 1.1754944e-38, %v1300_v20 }
 0x449   :  { %v1271_v39 = vsub.f32 1.0, %v1270_v56 }
 0x44a   :  { %v1253_v58 = vmul.f32 %v1839_v50, %v1252_v38  ;;  %vm1299_vm9 = vcmp.eq.f32.partialorder %v1298_v35, 8.507059e+37  ;;  %v1625_v35 = vld [vmem:[#allocation8 + $0x70] sm:$0xff] }
 0x44b   :  { %v1272_v40 = vmul.f32 %v1841_v34, %v1271_v39 }
 0x44c   :  { %v1843_v36 = vpop.eup %1842  ;;  %v1254_v47 = vadd.f32 %v1839_v50, %v1253_v58 }
 0x44d   :  { %v1273_v53 = vadd.f32 %v1841_v34, %v1272_v40  ;;  %v1290_v1 = vmul.f32 %v1843_v36, %v1288_v54  ;;  %v1845_v62 = vpop.eup %1844  ;;  %vm1295_vm6 = vweird.f32 %v1843_v36 }
 0x44e   :  { %v1258_v60 = vsel %vm1257_vm2, %v1839_v50, %v1254_v47  ;;  %vm1296_vm8 = vmor %vm1294_vm7, %vm1295_vm6 }
 0x44f   :  { %v1263_v3 = vsel %vm1260_vm4, %v1262_v41, %v1258_v60  ;;  %v1277_v10 = vsel %vm1276_vm3, %v1841_v34, %v1273_v53  ;;  %v1291_v5 = vsub.f32 1.0, %v1290_v1 }
 0x450   :  { %v1282_v22 = vsel %vm1279_vm5, %v1281_v59, %v1277_v10  ;;  %v1305_v48 = vmul.f32 %v1845_v62, %v1263_v3 }
 0x451   :  { %v1304_v13 = vmul.f32 %v1282_v22, %v2995_v46  ;;  %v1292_v8 = vmul.f32 %v1843_v36, %v1291_v5 }
 0x453   :  { %v3067_v7 = vadd.f32 %v1305_v48, %v1304_v13  ;;  %v1293_v12 = vadd.f32 %v1843_v36, %v1292_v8 }
 0x455   :  { %1846 = vtanh.f32 %v3067_v7  ;;  %v1297_v14 = vsel %vm1296_vm8, %v1843_v36, %v1293_v12 }
 0x456   :  { %v1302_v0 = vsel %vm1299_vm9, %v1301_v18, %v1297_v14  ;;  %v1624_v14 = vld [vmem:[#allocation8 + $0x68] sm:$0xff]  ;;  %v1623_v18 = vld [vmem:[#allocation8 + $0x60] sm:$0xff] }
 0x45b   :  { %v1847_v57 = vpop.eup %1846 }
 0x45c   :  { %v1308_v9 = vmul.f32 %v1847_v57, %v1302_v0  ;;  %v1622_v57 = vld [vmem:[#allocation8 + $0x58] sm:$0xff]  ;;  %v1621_v0 = vld [vmem:[#allocation8 + $0x50] sm:$0xff] }
 0x45e   :  { %1329 = vmatmul.f32.vlgmr.msrb.gmra.mxu0 %v1308_v9  ;;  %1349 = vmatmul.f32.vlgmr.msra.gmra.mxu1 %v1308_v9 }
 0x45f   :  { %1369 = vmatmul.f32.vlgmr.msra.gmra.mxu2 %v1308_v9  ;;  %1389 = vmatmul.f32.vlgmr.msra.gmra.mxu3 %v1308_v9  ;;  %v1620_v9 = vld [vmem:[#allocation8 + $0x48] sm:$0xff] }
 0x4db   :  { %v1330_v46 = vpop.f32.mrf.mxu0  ;;  %v1350_v63 = vpop.f32.mrf.mxu1 }
 0x4dc   :  { %v1393_v17 = vadd.f32 %v1330_v46, %v3391_v21  ;;  %v1394_v11 = vadd.f32 %v1350_v63, %v3392_v23  ;;  %v1619_v46 = vld [vmem:[#allocation8 + $0x40] sm:$0xff]  ;;  %v1618_v63 = vld [vmem:[#allocation8 + $0x38] sm:$0xff]  ;;  %v1617_v21 = vld [vmem:[#allocation8 + $0x30] sm:$0xff] }
 0x4de   :  { %v1724_v61 = vmul.f32 -1.442695, %v1393_v17  ;;  %v1725_v6 = vmul.f32 -1.442695, %v1394_v11  ;;  %v3395_v11 = vld [vmem:[#allocation41_spill] sm:$0xff] }
 0x4e0   :  { %1848 = vpow2.f32 %v1724_v61 }
 0x4e1   :  { %1850 = vpow2.f32 %v1725_v6  ;;  %v3396_v6 = vld [vmem:[#allocation64_spill] sm:$0xff] }
 0x4e2   :  { %v1390_v4 = vpop.f32.mrf.mxu3  ;;  %v1370_v29 = vpop.f32.mrf.mxu2 }
 0x4e3   :  { %v1396_v16 = vadd.f32 %v1390_v4, %v3393_v2  ;;  %v1395_v45 = vadd.f32 %v1370_v29, %v3394_v26  ;;  %v1616_v2 = vld [vmem:[#allocation8 + $0x28] sm:$0xff] }
 0x4e4   :  { %v1612_v29 = vld [vmem:[#allocation8 + $0x8] sm:$0xff] }
 0x4e5   :  { %v1726_v19 = vmul.f32 -1.442695, %v1396_v16 }
 0x4e6   :  { %v1849_v24 = vpop.eup %1848 }
 0x4e7   :  { %v1851_v25 = vpop.eup %1850  ;;  %v1400_v27 = vadd.f32 1.0, %v1849_v24  ;;  %1852 = vpow2.f32 %v1726_v19  ;;  %v1615_v24 = vld [vmem:[#allocation8 + $0x20] sm:$0xff] }
 0x4e8   :  { %v1419_v28 = vadd.f32 1.0, %v1851_v25  ;;  %v1614_v25 = vld [vmem:[#allocation8 + $0x18] sm:$0xff] }
 0x4e9   :  { %1854 = vrcp.f32 %v1400_v27  ;;  %v1412_v55 = vand.u32 2147483648, %v1400_v27  ;;  %v1410_v43 = vand.u32 2147483647, %v1400_v27  ;;  %vm1406_vm12 = vweird.f32 %v1400_v27 }
 0x4ea   :  { %1856 = vrcp.f32 %v1419_v28  ;;  %v1431_v52 = vand.u32 2147483648, %v1419_v28  ;;  %v1429_v38 = vand.u32 2147483647, %v1419_v28  ;;  %vm1425_vm13 = vweird.f32 %v1419_v28 }
 0x4eb   :  { %v1413_v30 = vor.u32 1.1754944e-38, %v1412_v55  ;;  %vm1411_vm0 = vcmp.eq.f32.partialorder %v1410_v43, 8.507059e+37 }
 0x4ec   :  { %v1432_v40 = vor.u32 1.1754944e-38, %v1431_v52  ;;  %vm1430_vm1 = vcmp.eq.f32.partialorder %v1429_v38, 8.507059e+37 }
 0x4ed   :  { %v1853_v31 = vpop.eup %1852 }
 0x4ee   :  { %v1439_v32 = vadd.f32 1.0, %v1853_v31  ;;  %v3397_v31 = vld [vmem:[#allocation66_spill] sm:$0xff] }
 0x4ef   :  { %v1855_v49 = vpop.eup %1854 }
 0x4f0   :  { %v1857_v33 = vpop.eup %1856  ;;  %v1402_v37 = vmul.f32 %v1855_v49, %v1400_v27  ;;  %1858 = vrcp.f32 %v1439_v32  ;;  %vm1407_vm10 = vweird.f32 %v1855_v49  ;;  %v1451_v5 = vand.u32 2147483648, %v1439_v32  ;;  %v1613_v27 = vld [vmem:[#allocation8 + $0x10] sm:$0xff] }
 0x4f1   :  { %v1421_v15 = vmul.f32 %v1857_v33, %v1419_v28  ;;  %1860 = vtanh.f32 %v1395_v45  ;;  %vm1426_vm11 = vweird.f32 %v1857_v33  ;;  %vm1408_vm14 = vmor %vm1406_vm12, %vm1407_vm10  ;;  %vm1445_vm3 = vweird.f32 %v1439_v32 }
 0x4f2   :  { %v1403_v54 = vsub.f32 1.0, %v1402_v37  ;;  %vm1427_vm15 = vmor %vm1425_vm13, %vm1426_vm11  ;;  %v1449_v22 = vand.u32 2147483647, %v1439_v32  ;;  %v1452_v13 = vor.u32 1.1754944e-38, %v1451_v5 }
 0x4f3   :  { %v1422_v50 = vsub.f32 1.0, %v1421_v15 }
 0x4f4   :  { %v1404_v34 = vmul.f32 %v1855_v49, %v1403_v54  ;;  %vm1450_vm5 = vcmp.eq.f32.partialorder %v1449_v22, 8.507059e+37 }
 0x4f5   :  { %v1423_v56 = vmul.f32 %v1857_v33, %v1422_v50 }
 0x4f6   :  { %v1859_v39 = vpop.eup %1858  ;;  %v1405_v51 = vadd.f32 %v1855_v49, %v1404_v34  ;;  %v3398_v34 = vld [vmem:[#allocation65_spill] sm:$0xff] }
 0x4f7   :  { %v1424_v58 = vadd.f32 %v1857_v33, %v1423_v56  ;;  %v1441_v44 = vmul.f32 %v1859_v39, %v1439_v32  ;;  %v1861_v36 = vpop.eup %1860  ;;  %vm1446_vm2 = vweird.f32 %v1859_v39 }
 0x4f8   :  { %v1409_v42 = vsel %vm1408_vm14, %v1855_v49, %v1405_v51  ;;  %vm1447_vm4 = vmor %vm1445_vm3, %vm1446_vm2  ;;  %v1611_v49 = vld [vmem:[#allocation8] sm:$0xff] }
 0x4f9   :  { %v1414_v47 = vsel %vm1411_vm0, %v1413_v30, %v1409_v42  ;;  %v1428_v41 = vsel %vm1427_vm15, %v1857_v33, %v1424_v58  ;;  %v1442_v53 = vsub.f32 1.0, %v1441_v44 }
 0x4fa   :  { %v1433_v1 = vsel %vm1430_vm1, %v1432_v40, %v1428_v41  ;;  %v1456_v59 = vmul.f32 %v1861_v36, %v1414_v47 }
 0x4fb   :  { %v1455_v60 = vmul.f32 %v1433_v1, %v3067_v7  ;;  %v1443_v62 = vmul.f32 %v1859_v39, %v1442_v53  ;;  %v1626_v7 = vld [vmem:[#allocation8 + $0x78] sm:$0xff] }
 0x4fc   :  { %1631 = vmatpush.msrb.mxu0 %v1626_v7 }
 0x4fd   :  { %v3075_v3 = vadd.f32 %v1456_v59, %v1455_v60  ;;  %v1444_v10 = vadd.f32 %v1859_v39, %v1443_v62 }
 0x4fe   :  { %1632 = vmatpush.msrb.mxu0 %v1625_v35 }
 0x4ff   :  { %1862 = vtanh.f32 %v3075_v3  ;;  %v1448_v48 = vsel %vm1447_vm4, %v1859_v39, %v1444_v10 }
 0x500   :  { %v1453_v12 = vsel %vm1450_vm5, %v1452_v13, %v1448_v48  ;;  %1633 = vmatpush.msrb.mxu0 %v1624_v14 }
 0x502   :  { %1634 = vmatpush.msrb.mxu0 %v1623_v18 }
 0x504   :  { %1635 = vmatpush.msrb.mxu0 %v1622_v57 }
 0x505   :  { %v1863_v8 = vpop.eup %1862 }
 0x506   :  { %v1459_v20 = vmul.f32 %v1863_v8, %v1453_v12  ;;  %1636 = vmatpush.msrb.mxu0 %v1621_v0 }
 0x508   :  { %1480 = vmatmul.f32.vlgmr.msra.gmra.mxu0 %v1459_v20  ;;  %1500 = vmatmul.f32.vlgmr.msrb.gmra.mxu1 %v1459_v20 }
 0x509   :  { %1520 = vmatmul.f32.vlgmr.msrb.gmra.mxu2 %v1459_v20  ;;  %1540 = vmatmul.f32.vlgmr.msrb.gmra.mxu3 %v1459_v20 }
 0x50a   :  { %1637 = vmatpush.msrb.mxu0 %v1620_v9 }
 0x50c   :  { %1638 = vmatpush.msrb.mxu0 %v1619_v46 }
 0x50e   :  { %1639 = vmatpush.msrb.mxu0 %v1618_v63 }
 0x510   :  { %1640 = vmatpush.msrb.mxu0 %v1617_v21 }
 0x512   :  { %1641 = vmatpush.msrb.mxu0 %v1616_v2 }
 0x514   :  { %1642 = vmatpush.msrb.mxu0 %v1615_v24 }
 0x516   :  { %1643 = vmatpush.msrb.mxu0 %v1614_v25 }
 0x518   :  { %1644 = vmatpush.msrb.mxu0 %v1613_v27 }
 0x51a   :  { %1645 = vmatpush.msrb.mxu0 %v1612_v29 }
 0x51c   :  { %1646 = vmatpush.msrb.mxu0 %v1611_v49 }
 0x585   :  { %v1481_v17 = vpop.f32.mrf.mxu0  ;;  %v1501_v23 = vpop.f32.mrf.mxu1 }
 0x586   :  { %v1544_v61 = vadd.f32 %v1481_v17, %v3395_v11  ;;  %v1545_v4 = vadd.f32 %v1501_v23, %v3396_v6 }
 0x588   :  { %v1727_v16 = vmul.f32 -1.442695, %v1544_v61  ;;  %v1728_v19 = vmul.f32 -1.442695, %v1545_v4 }
 0x58a   :  { %1864 = vpow2.f32 %v1727_v16 }
 0x58b   :  { %1866 = vpow2.f32 %v1728_v19 }
 0x58c   :  { %v1541_v28 = vpop.f32.mrf.mxu3  ;;  %v1521_v54 = vpop.f32.mrf.mxu2 }
 0x58d   :  { %v1547_v32 = vadd.f32 %v1541_v28, %v3397_v31  ;;  %v1546_v43 = vadd.f32 %v1521_v54, %v3398_v34 }
 0x58f   :  { %v1729_v26 = vmul.f32 -1.442695, %v1547_v32 }
 0x590   :  { %v1865_v45 = vpop.eup %1864 }
 0x591   :  { %v1867_v33 = vpop.eup %1866  ;;  %v1551_v37 = vadd.f32 1.0, %v1865_v45  ;;  %1868 = vpow2.f32 %v1729_v26 }
 0x592   :  { %v1570_v15 = vadd.f32 1.0, %v1867_v33 }
 0x593   :  { %1870 = vrcp.f32 %v1551_v37  ;;  %v1563_v58 = vand.u32 2147483648, %v1551_v37  ;;  %v1561_v42 = vand.u32 2147483647, %v1551_v37  ;;  %vm1557_vm8 = vweird.f32 %v1551_v37 }
 0x594   :  { %1872 = vrcp.f32 %v1570_v15  ;;  %v1582_v44 = vand.u32 2147483648, %v1570_v15  ;;  %v1580_v47 = vand.u32 2147483647, %v1570_v15  ;;  %vm1576_vm9 = vweird.f32 %v1570_v15 }
 0x595   :  { %v1564_v1 = vor.u32 1.1754944e-38, %v1563_v58  ;;  %vm1562_vm12 = vcmp.eq.f32.partialorder %v1561_v42, 8.507059e+37 }
 0x596   :  { %v1583_v62 = vor.u32 1.1754944e-38, %v1582_v44  ;;  %vm1581_vm13 = vcmp.eq.f32.partialorder %v1580_v47, 8.507059e+37 }
 0x597   :  { %v1869_v50 = vpop.eup %1868 }
 0x598   :  { %v1590_v55 = vadd.f32 1.0, %v1869_v50 }
 0x599   :  { %v1871_v52 = vpop.eup %1870 }
 0x59a   :  { %v1873_v56 = vpop.eup %1872  ;;  %v1553_v38 = vmul.f32 %v1871_v52, %v1551_v37  ;;  %1874 = vrcp.f32 %v1590_v55  ;;  %vm1558_vm6 = vweird.f32 %v1871_v52  ;;  %v1602_v18 = vand.u32 2147483648, %v1590_v55 }
 0x59b   :  { %v1572_v39 = vmul.f32 %v1873_v56, %v1570_v15  ;;  %1876 = vtanh.f32 %v1546_v43  ;;  %vm1577_vm7 = vweird.f32 %v1873_v56  ;;  %vm1559_vm10 = vmor %vm1557_vm8, %vm1558_vm6  ;;  %vm1596_vm15 = vweird.f32 %v1590_v55 }
 0x59c   :  { %v1554_v51 = vsub.f32 1.0, %v1553_v38  ;;  %vm1578_vm11 = vmor %vm1576_vm9, %vm1577_vm7  ;;  %v1600_v57 = vand.u32 2147483647, %v1590_v55  ;;  %v1603_v9 = vor.u32 1.1754944e-38, %v1602_v18 }
 0x59d   :  { %v1573_v30 = vsub.f32 1.0, %v1572_v39 }
 0x59e   :  { %v1555_v40 = vmul.f32 %v1871_v52, %v1554_v51  ;;  %vm1601_vm1 = vcmp.eq.f32.partialorder %v1600_v57, 8.507059e+37 }
 0x59f   :  { %v1574_v36 = vmul.f32 %v1873_v56, %v1573_v30 }
 0x5a0   :  { %v1875_v41 = vpop.eup %1874  ;;  %v1556_v53 = vadd.f32 %v1871_v52, %v1555_v40 }
 0x5a1   :  { %v1575_v59 = vadd.f32 %v1873_v56, %v1574_v36  ;;  %v1592_v60 = vmul.f32 %v1875_v41, %v1590_v55  ;;  %v1877_v5 = vpop.eup %1876  ;;  %vm1597_vm14 = vweird.f32 %v1875_v41 }
 0x5a2   :  { %v1560_v10 = vsel %vm1559_vm10, %v1871_v52, %v1556_v53  ;;  %vm1598_vm0 = vmor %vm1596_vm15, %vm1597_vm14 }
 0x5a3   :  { %v1565_v22 = vsel %vm1562_vm12, %v1564_v1, %v1560_v10  ;;  %v1579_v48 = vsel %vm1578_vm11, %v1873_v56, %v1575_v59  ;;  %v1593_v13 = vsub.f32 1.0, %v1592_v60 }
 0x5a4   :  { %v1584_v8 = vsel %vm1581_vm13, %v1583_v62, %v1579_v48  ;;  %v1607_v12 = vmul.f32 %v1877_v5, %v1565_v22 }
 0x5a5   :  { %v1606_v20 = vmul.f32 %v1584_v8, %v3075_v3  ;;  %v1594_v7 = vmul.f32 %v1875_v41, %v1593_v13  ;;  %v1751_v3 = vld [vmem:[%s3094_s5] ss:$0 sm:$0xff] }
 0x5a7   :  { %v1608_v35 = vadd.f32 %v1607_v12, %v1606_v20  ;;  %v1595_v14 = vadd.f32 %v1875_v41, %v1594_v7 }
 0x5a9   :  { %1878 = vtanh.f32 %v1608_v35  ;;  %v1599_v0 = vsel %vm1598_vm0, %v1875_v41, %v1595_v14 }
 0x5aa   :  { %v1604_v63 = vsel %vm1601_vm1, %v1603_v9, %v1599_v0 }
 0x5af   :  { %v1879_v46 = vpop.eup %1878 }
 0x5b0   :  { %v1610_v21 = vmul.f32 %v1879_v46, %v1604_v63 }
 0x5b2   :  { %1647 = vmatmul.f32.vlgmr.msrb.gmra.mxu0 %v1610_v21 }
 0x62f   :  { %v1648_v17 = vpop.f32.mrf.mxu0 }
 0x630   :  { %v1649_v23 = vadd.f32 %v1751_v3, %v1648_v17 }
 0x632   :  { %1651 = vst [vmem:[#allocation9] sm:$0xff] %v1649_v23 }
 0x633   :  { %1662 = dma.vmem_to_hbm [thread:$0]  %s1658_s8, 128, %s1660_s11, [#allocation5]  }
 0x634   :  { %2044 = dma.done.wait [#allocation5], 128  }
 0x635   :  { %2045 = vsyncadd [#allocation5], 4294967168 }
 0x636   :  { %1667 = vsyncpa [#allocation4], 1 }
 0x637   :  { %1668 = vsyncpa [#allocation7], 1 }
 0x638   :  { %1669 = vsyncpa [#allocation5], 1 }

</bundles_post_ra>
